<compile_context>
chip_gen: v7x
topology: tpu7x:2x2x1
jax: 0.10.0
libtpu: 0.0.40
codegen_flags: <defaults>
</compile_context>

<pallas_src>
import numpy as np
import jax
import jax.numpy as jnp
from jax import lax
from jax.experimental import pallas as pl
from jax.experimental.pallas import tpu as pltpu

DS = 13                  # CRN downsample size (13x13)
PAD = 3                  # reflect pad of the largest conv (7x7)
PADW = DS + 2 * PAD      # 19
FLAT = PADW * PADW       # 361 flattened padded positions
FLAT_PAD = 384           # lane-aligned padded-flat length (3 * 128)
QLEN = 256               # over-computed flat output length (>= 12*19+12 = 240)
K7 = 7                   # largest conv support / number of row shifts
COUT = 84                # 32 + 32 + 20 concatenated conv channels
CPAD = 96                # sublane-aligned padded output channel count


# ----------------------------- Pallas kernel -------------------------------
def _crn_kernel(x_ref, w_ref, misc_ref, out_ref):
    # x_ref   : (B, 7*C, 384) bf16  column-shift-stacked, reflect-padded,
    #                               flattened 19x19 downsampled image
    # w_ref   : (7, 96, 7*C)  bf16  grouped conv weights (one slab per row shift)
    # misc_ref: (96, 3)       f32   [:,0]=bias, [:,1]=convw weight, [0,2]=convw bias
    # out_ref : (B, 1, 256)   f32   over-computed flat reweight rows
    bias = jnp.broadcast_to(misc_ref[:, 0:1], (CPAD, QLEN))   # hoisted broadcasts
    ww = jnp.broadcast_to(misc_ref[:, 1:2], (CPAD, QLEN))
    bw = misc_ref[0:1, 2:3]

    def body(b, carry):
        # Two independent partial accumulators break the MXU-pop -> add chain.
        acc0 = jnp.zeros((CPAD, QLEN), jnp.float32)
        acc1 = jnp.zeros((CPAD, QLEN), jnp.float32)
        for i in range(K7):                                   # 7 grouped matmuls
            slab = x_ref[b, :, pl.ds(i * PADW, QLEN)]         # (7*C, 256) bf16
            part = jnp.dot(w_ref[i], slab,
                           preferred_element_type=jnp.float32)  # (96, 256) f32
            if i % 2 == 0:
                acc0 = acc0 + part
            else:
                acc1 = acc1 + part
        acc = acc0 + acc1
        g = jnp.maximum(acc + bias, 0.0)                      # per-conv ReLU
        # convw (1x1 over 84 ch) on VPU + XLU: broadcast-mul + sublane reduce.
        row = jnp.sum(g * ww, axis=0, keepdims=True) + bw     # (1, 256)
        out_ref[b] = jnp.maximum(row, 0.0)                    # final ReLU
        return carry

    nb = x_ref.shape[0]                                       # static block batch
    if nb == 1:
        body(0, None)
    else:
        lax.fori_loop(0, nb, body, None, unroll=True)


# ------------------------------- packing ------------------------------------
def init_crn_params(key, dim):
    """Deterministic synthetic parameters with the shapes CRN.__init__ implies."""
    ks = jax.random.split(key, 8)
    s = 0.05
    return dict(
        w3=s * jax.random.normal(ks[0], (32, dim, 3, 3), jnp.float32),
        b3=s * jax.random.normal(ks[1], (32,), jnp.float32),
        w5=s * jax.random.normal(ks[2], (32, dim, 5, 5), jnp.float32),
        b5=s * jax.random.normal(ks[3], (32,), jnp.float32),
        w7=s * jax.random.normal(ks[4], (20, dim, 7, 7), jnp.float32),
        b7=s * jax.random.normal(ks[5], (20,), jnp.float32),
        ww=s * jax.random.normal(ks[6], (1, 84, 1, 1), jnp.float32),
        bw=s * jax.random.normal(ks[7], (1,), jnp.float32),
    )


def pack_crn_params(params):
    """One-time packing of all CRN parameters (hoist out of the per-call path).

    Per shift (i, j) of the 7x7 support the combined weight slab is (96, C):
    rows 0:32 = conv3 (support i,j in 2..4), 32:64 = conv5 (1..5), 64:84 = conv7,
    84:96 = zero padding.  The 7 column shifts j are then grouped into one
    K = 7*C contraction per row shift i -> (7, 96, 7*C) bf16.
    """
    c = params['w3'].shape[1]
    wall = jnp.zeros((K7, K7, CPAD, c), jnp.float32)
    wall = wall.at[2:5, 2:5, 0:32, :].set(jnp.transpose(params['w3'], (2, 3, 0, 1)))
    wall = wall.at[1:6, 1:6, 32:64, :].set(jnp.transpose(params['w5'], (2, 3, 0, 1)))
    wall = wall.at[:, :, 64:84, :].set(jnp.transpose(params['w7'], (2, 3, 0, 1)))
    wgrp = jnp.transpose(wall, (0, 2, 1, 3)).reshape(K7, CPAD, K7 * c)
    wgrp = wgrp.astype(jnp.bfloat16)

    bcat = jnp.concatenate([params['b3'], params['b5'], params['b7']])   # (84,)
    misc = jnp.zeros((CPAD, 3), jnp.float32)
    misc = misc.at[:COUT, 0].set(bcat)
    misc = misc.at[:COUT, 1].set(params['ww'].reshape(COUT))
    misc = misc.at[0, 2].set(params['bw'][0])
    return wgrp, misc


# --------------------------- resize index tables -----------------------------
def _nearest_idx_np(out_size, in_size):
    # PyTorch F.interpolate(mode='nearest'): src = (dst * in) // out (integer)
    return (np.arange(out_size, dtype=np.int64) * in_size) // out_size


def _reflect_idx_np(padded_size, size, pad):
    q = np.arange(padded_size, dtype=np.int64) - pad
    q = np.abs(q)
    return np.where(q > size - 1, 2 * (size - 1) - q, q)


def _build_gather_indices(h, w):
    """Trace-time-constant gather tables fusing downsample+reflect-pad+stack
    (input side) and nearest upsample (output side)."""
    src_h = _nearest_idx_np(DS, h)                    # (13,) nearest rows
    src_w = _nearest_idx_np(DS, w)
    refl = _reflect_idx_np(PADW, DS, PAD)             # (19,) reflect-pad-3 of 13
    row_full = src_h[refl]                            # (19,) full-res rows
    col_full = src_w[refl]                            # (19,) full-res cols
    flat_src = (row_full[:, None] * w + col_full[None, :]).reshape(FLAT)  # (361,)
    # Column-shift-stacked gather: [j, t] = source flat index for stacked lane t
    # of shift j.  Clamped entries only feed garbage output lanes never read back.
    t = np.arange(FLAT_PAD, dtype=np.int64)
    shifted = np.minimum(t[None, :] + np.arange(K7, dtype=np.int64)[:, None],
                         FLAT - 1)
    gather_in = flat_src[shifted]                     # (7, 384)
    # Nearest upsample straight from the 256-lane flat kernel output.
    up_r = _nearest_idx_np(h, DS)
    up_c = _nearest_idx_np(w, DS)
    gather_out = (up_r[:, None] * PADW + up_c[None, :]).reshape(h * w)    # (H*W,)
    return (jnp.asarray(gather_in, jnp.int32), jnp.asarray(gather_out, jnp.int32))


def _batch_block(n):
    # Keep >= 2 grid steps (both v7x TensorCores get work) while amortizing
    # the ~0.35us per-grid-step overhead; cap the per-step batch at 8.
    if n <= 1:
        return 1
    return max(1, min(8, (n + 1) // 2))


# ------------------------------- forward ------------------------------------
def crn_forward(x, wgrp, misc):
    """x: (N, C, H, W) float32 -> reweight mask (N, 1, H*W) float32."""
    n, c, h, w = x.shape
    gidx_in, gidx_out = _build_gather_indices(h, w)           # constants under jit

    # Fused nearest-downsample + reflect-pad + flatten + column-shift stack:
    # a single gather from full-resolution x, then lane-align and cast to bf16.
    src = x.reshape(n, c, h * w)
    stacked = jnp.take(src, gidx_in, axis=2)                  # (N, C, 7, 384)
    stacked = jnp.transpose(stacked, (0, 2, 1, 3)).reshape(n, K7 * c, FLAT_PAD)
    stacked = stacked.astype(jnp.bfloat16)

    bblk = _batch_block(n)
    n_grid = -(-n // bblk)
    n_pad = n_grid * bblk
    if n_pad != n:
        stacked = jnp.pad(stacked, ((0, n_pad - n), (0, 0), (0, 0)))

    w_out = pl.pallas_call(
        _crn_kernel,
        out_shape=jax.ShapeDtypeStruct((n_pad, 1, QLEN), jnp.float32),
        grid_spec=pltpu.PrefetchScalarGridSpec(
            num_scalar_prefetch=0,
            grid=(n_grid,),
            in_specs=[
                pl.BlockSpec((bblk, K7 * c, FLAT_PAD), lambda i: (i, 0, 0)),
                pl.BlockSpec((K7, CPAD, K7 * c), lambda i: (0, 0, 0)),
                pl.BlockSpec((CPAD, 3), lambda i: (0, 0)),
            ],
            out_specs=pl.BlockSpec((bblk, 1, QLEN), lambda i: (i, 0, 0)),
        ),
        compiler_params=pltpu.CompilerParams(
            dimension_semantics=("parallel",)),
    )(stacked, wgrp, misc)

    # F.interpolate(w_out, (H, W), 'nearest') + flatten: one gather over the
    # valid flat positions q = r*19 + s (r, s <= 12) of the 256-lane output.
    up = jnp.take(w_out[:n, 0, :], gidx_out, axis=1)          # (N, H*W)
    return up.reshape(n, 1, h * w)


if __name__ == "__main__":
    # Small shapes consistent with the module: dim (input channels) = 32,
    # batch = 2, spatial 16x16.
    N, DIM, H, W = 2, 32, 16, 16
    key = jax.random.PRNGKey(0)
    kx, kp = jax.random.split(key)
    x = jax.random.normal(kx, (N, DIM, H, W), jnp.float32)
    params = init_crn_params(kp, DIM)

    wgrp, misc = jax.block_until_ready(pack_crn_params(params))  # packed once
    fwd = jax.jit(crn_forward)
    out = jax.block_until_ready(fwd(x, wgrp, misc))
    assert out.shape == (N, 1, H * W), out.shape
    assert bool(jnp.all(out >= 0.0))          # final ReLU
    print("KERNEL_OK")
</pallas_src>

<mosaic_0001>
module attributes {stable_mosaic.version = 11 : i64} {
  func.func @_crn_kernel(%arg0: i32, %arg1: memref<1x224x384xbf16, #tpu.memory_space<vmem>>, %arg2: memref<7x96x224xbf16, #tpu.memory_space<vmem>>, %arg3: memref<96x3xf32, #tpu.memory_space<vmem>>, %arg4: memref<1x1x256xf32, #tpu.memory_space<vmem>>) attributes {dimension_semantics = [#tpu.dimension_semantics<parallel>], iteration_bounds = array<i64: 2>, scalar_prefetch = 0 : i64, scratch_operands = 0 : i64, tpu.core_type = #tpu.core_type<tc>, window_params = [{transform_indices = @transform_0, window_bounds = array<i64: 1, 224, 384>}, {pipeline_mode = #tpu.pipeline_mode<synchronous>, transform_indices = @transform_1, window_bounds = array<i64: 7, 96, 224>}, {pipeline_mode = #tpu.pipeline_mode<synchronous>, transform_indices = @transform_2, window_bounds = array<i64: 96, 3>}, {transform_indices = @transform_3, window_bounds = array<i64: 1, 1, 256>}]} {
    %c0 = arith.constant 0 : index
    %c0_0 = arith.constant 0 : index
    %0 = vector.load %arg3[%c0, %c0_0] : memref<96x3xf32, #tpu.memory_space<vmem>>, vector<96x1xf32>
    %1 = vector.shape_cast %0 : vector<96x1xf32> to vector<96x1xf32>
    %2 = vector.broadcast %1 : vector<96x1xf32> to vector<96x256xf32>
    %c0_1 = arith.constant 0 : index
    %c1 = arith.constant 1 : index
    %3 = vector.load %arg3[%c0_1, %c1] : memref<96x3xf32, #tpu.memory_space<vmem>>, vector<96x1xf32>
    %4 = vector.shape_cast %3 : vector<96x1xf32> to vector<96x1xf32>
    %5 = vector.broadcast %4 : vector<96x1xf32> to vector<96x256xf32>
    %c0_2 = arith.constant 0 : index
    %c2 = arith.constant 2 : index
    %6 = vector.load %arg3[%c0_2, %c2] : memref<96x3xf32, #tpu.memory_space<vmem>>, vector<1x1xf32>
    %cst = arith.constant 0.000000e+00 : f32
    %7 = vector.broadcast %cst : f32 to vector<96x256xf32>
    %cst_3 = arith.constant 0.000000e+00 : f32
    %8 = vector.broadcast %cst_3 : f32 to vector<96x256xf32>
    %c0_4 = arith.constant 0 : index
    %c0_5 = arith.constant 0 : index
    %c0_6 = arith.constant 0 : index
    %9 = vector.load %arg1[%c0_4, %c0_5, %c0_6] : memref<1x224x384xbf16, #tpu.memory_space<vmem>>, vector<1x224x256xbf16>
    %10 = vector.shape_cast %9 : vector<1x224x256xbf16> to vector<224x256xbf16>
    %c0_7 = arith.constant 0 : index
    %c0_8 = arith.constant 0 : index
    %c0_9 = arith.constant 0 : index
    %11 = vector.load %arg2[%c0_7, %c0_8, %c0_9] : memref<7x96x224xbf16, #tpu.memory_space<vmem>>, vector<1x96x224xbf16>
    %12 = vector.shape_cast %11 : vector<1x96x224xbf16> to vector<96x224xbf16>
    %cst_10 = arith.constant dense<0.000000e+00> : vector<96x256xf32>
    %13 = tpu.matmul %12, %10, %cst_10 {dimension_numbers = #tpu.dot_dimension_numbers<[1], [0], [0], [1], [0, 0, 1, 1], [], []>} : vector<96x224xbf16>, vector<224x256xbf16>, vector<96x256xf32> -> vector<96x256xf32>
    %14 = arith.addf %7, %13 : vector<96x256xf32>
    %c0_11 = arith.constant 0 : index
    %c0_12 = arith.constant 0 : index
    %c19 = arith.constant 19 : index
    %15 = vector.load %arg1[%c0_11, %c0_12, %c19] : memref<1x224x384xbf16, #tpu.memory_space<vmem>>, vector<1x224x256xbf16>
    %16 = vector.shape_cast %15 : vector<1x224x256xbf16> to vector<224x256xbf16>
    %c1_13 = arith.constant 1 : index
    %c0_14 = arith.constant 0 : index
    %c0_15 = arith.constant 0 : index
    %17 = vector.load %arg2[%c1_13, %c0_14, %c0_15] : memref<7x96x224xbf16, #tpu.memory_space<vmem>>, vector<1x96x224xbf16>
    %18 = vector.shape_cast %17 : vector<1x96x224xbf16> to vector<96x224xbf16>
    %cst_16 = arith.constant dense<0.000000e+00> : vector<96x256xf32>
    %19 = tpu.matmul %18, %16, %cst_16 {dimension_numbers = #tpu.dot_dimension_numbers<[1], [0], [0], [1], [0, 0, 1, 1], [], []>} : vector<96x224xbf16>, vector<224x256xbf16>, vector<96x256xf32> -> vector<96x256xf32>
    %20 = arith.addf %8, %19 : vector<96x256xf32>
    %c0_17 = arith.constant 0 : index
    %c0_18 = arith.constant 0 : index
    %c38 = arith.constant 38 : index
    %21 = vector.load %arg1[%c0_17, %c0_18, %c38] : memref<1x224x384xbf16, #tpu.memory_space<vmem>>, vector<1x224x256xbf16>
    %22 = vector.shape_cast %21 : vector<1x224x256xbf16> to vector<224x256xbf16>
    %c2_19 = arith.constant 2 : index
    %c0_20 = arith.constant 0 : index
    %c0_21 = arith.constant 0 : index
    %23 = vector.load %arg2[%c2_19, %c0_20, %c0_21] : memref<7x96x224xbf16, #tpu.memory_space<vmem>>, vector<1x96x224xbf16>
    %24 = vector.shape_cast %23 : vector<1x96x224xbf16> to vector<96x224xbf16>
    %cst_22 = arith.constant dense<0.000000e+00> : vector<96x256xf32>
    %25 = tpu.matmul %24, %22, %cst_22 {dimension_numbers = #tpu.dot_dimension_numbers<[1], [0], [0], [1], [0, 0, 1, 1], [], []>} : vector<96x224xbf16>, vector<224x256xbf16>, vector<96x256xf32> -> vector<96x256xf32>
    %26 = arith.addf %14, %25 : vector<96x256xf32>
    %c0_23 = arith.constant 0 : index
    %c0_24 = arith.constant 0 : index
    %c57 = arith.constant 57 : index
    %27 = vector.load %arg1[%c0_23, %c0_24, %c57] : memref<1x224x384xbf16, #tpu.memory_space<vmem>>, vector<1x224x256xbf16>
    %28 = vector.shape_cast %27 : vector<1x224x256xbf16> to vector<224x256xbf16>
    %c3 = arith.constant 3 : index
    %c0_25 = arith.constant 0 : index
    %c0_26 = arith.constant 0 : index
    %29 = vector.load %arg2[%c3, %c0_25, %c0_26] : memref<7x96x224xbf16, #tpu.memory_space<vmem>>, vector<1x96x224xbf16>
    %30 = vector.shape_cast %29 : vector<1x96x224xbf16> to vector<96x224xbf16>
    %cst_27 = arith.constant dense<0.000000e+00> : vector<96x256xf32>
    %31 = tpu.matmul %30, %28, %cst_27 {dimension_numbers = #tpu.dot_dimension_numbers<[1], [0], [0], [1], [0, 0, 1, 1], [], []>} : vector<96x224xbf16>, vector<224x256xbf16>, vector<96x256xf32> -> vector<96x256xf32>
    %32 = arith.addf %20, %31 : vector<96x256xf32>
    %c0_28 = arith.constant 0 : index
    %c0_29 = arith.constant 0 : index
    %c76 = arith.constant 76 : index
    %33 = vector.load %arg1[%c0_28, %c0_29, %c76] : memref<1x224x384xbf16, #tpu.memory_space<vmem>>, vector<1x224x256xbf16>
    %34 = vector.shape_cast %33 : vector<1x224x256xbf16> to vector<224x256xbf16>
    %c4 = arith.constant 4 : index
    %c0_30 = arith.constant 0 : index
    %c0_31 = arith.constant 0 : index
    %35 = vector.load %arg2[%c4, %c0_30, %c0_31] : memref<7x96x224xbf16, #tpu.memory_space<vmem>>, vector<1x96x224xbf16>
    %36 = vector.shape_cast %35 : vector<1x96x224xbf16> to vector<96x224xbf16>
    %cst_32 = arith.constant dense<0.000000e+00> : vector<96x256xf32>
    %37 = tpu.matmul %36, %34, %cst_32 {dimension_numbers = #tpu.dot_dimension_numbers<[1], [0], [0], [1], [0, 0, 1, 1], [], []>} : vector<96x224xbf16>, vector<224x256xbf16>, vector<96x256xf32> -> vector<96x256xf32>
    %38 = arith.addf %26, %37 : vector<96x256xf32>
    %c0_33 = arith.constant 0 : index
    %c0_34 = arith.constant 0 : index
    %c95 = arith.constant 95 : index
    %39 = vector.load %arg1[%c0_33, %c0_34, %c95] : memref<1x224x384xbf16, #tpu.memory_space<vmem>>, vector<1x224x256xbf16>
    %40 = vector.shape_cast %39 : vector<1x224x256xbf16> to vector<224x256xbf16>
    %c5 = arith.constant 5 : index
    %c0_35 = arith.constant 0 : index
    %c0_36 = arith.constant 0 : index
    %41 = vector.load %arg2[%c5, %c0_35, %c0_36] : memref<7x96x224xbf16, #tpu.memory_space<vmem>>, vector<1x96x224xbf16>
    %42 = vector.shape_cast %41 : vector<1x96x224xbf16> to vector<96x224xbf16>
    %cst_37 = arith.constant dense<0.000000e+00> : vector<96x256xf32>
    %43 = tpu.matmul %42, %40, %cst_37 {dimension_numbers = #tpu.dot_dimension_numbers<[1], [0], [0], [1], [0, 0, 1, 1], [], []>} : vector<96x224xbf16>, vector<224x256xbf16>, vector<96x256xf32> -> vector<96x256xf32>
    %44 = arith.addf %32, %43 : vector<96x256xf32>
    %c0_38 = arith.constant 0 : index
    %c0_39 = arith.constant 0 : index
    %c114 = arith.constant 114 : index
    %45 = vector.load %arg1[%c0_38, %c0_39, %c114] : memref<1x224x384xbf16, #tpu.memory_space<vmem>>, vector<1x224x256xbf16>
    %46 = vector.shape_cast %45 : vector<1x224x256xbf16> to vector<224x256xbf16>
    %c6 = arith.constant 6 : index
    %c0_40 = arith.constant 0 : index
    %c0_41 = arith.constant 0 : index
    %47 = vector.load %arg2[%c6, %c0_40, %c0_41] : memref<7x96x224xbf16, #tpu.memory_space<vmem>>, vector<1x96x224xbf16>
    %48 = vector.shape_cast %47 : vector<1x96x224xbf16> to vector<96x224xbf16>
    %cst_42 = arith.constant dense<0.000000e+00> : vector<96x256xf32>
    %49 = tpu.matmul %48, %46, %cst_42 {dimension_numbers = #tpu.dot_dimension_numbers<[1], [0], [0], [1], [0, 0, 1, 1], [], []>} : vector<96x224xbf16>, vector<224x256xbf16>, vector<96x256xf32> -> vector<96x256xf32>
    %50 = arith.addf %38, %49 : vector<96x256xf32>
    %51 = arith.addf %50, %44 : vector<96x256xf32>
    %52 = arith.addf %51, %2 : vector<96x256xf32>
    %cst_43 = arith.constant 0.000000e+00 : f32
    %53 = vector.broadcast %cst_43 : f32 to vector<96x256xf32>
    %54 = arith.maximumf %52, %53 : vector<96x256xf32>
    %55 = arith.mulf %54, %5 : vector<96x256xf32>
    %cst_44 = arith.constant dense<0.000000e+00> : vector<256xf32>
    %56 = vector.multi_reduction <add>, %55, %cst_44 [0] : vector<96x256xf32> to vector<256xf32>
    %57 = vector.shape_cast %56 : vector<256xf32> to vector<1x256xf32>
    %58 = vector.broadcast %6 : vector<1x1xf32> to vector<1x256xf32>
    %59 = arith.addf %57, %58 : vector<1x256xf32>
    %cst_45 = arith.constant 0.000000e+00 : f32
    %60 = vector.broadcast %cst_45 : f32 to vector<1x256xf32>
    %61 = arith.maximumf %59, %60 : vector<1x256xf32>
    %c0_46 = arith.constant 0 : index
    %c0_47 = arith.constant 0 : index
    %c0_48 = arith.constant 0 : index
    %62 = vector.load %arg4[%c0_46, %c0_47, %c0_48] : memref<1x1x256xf32, #tpu.memory_space<vmem>>, vector<1x1x256xf32>
    %63 = vector.shape_cast %62 : vector<1x1x256xf32> to vector<1x256xf32>
    %64 = vector.shape_cast %61 : vector<1x256xf32> to vector<1x1x256xf32>
    tpu.vector_store %arg4[%c0_46, %c0_47, %c0_48], %64 {strides = array<i32>} : memref<1x1x256xf32, #tpu.memory_space<vmem>>, vector<1x1x256xf32>,
    return
  }
  func.func @transform_0(%arg0: i32) -> (i32, i32, i32) {
    %c0_i32 = arith.constant 0 : i32
    %c0_i32_0 = arith.constant 0 : i32
    %c0_i32_1 = arith.constant 0 : i32
    return %arg0, %c0_i32, %c0_i32_0 : i32, i32, i32
  }
  func.func @transform_1(%arg0: i32) -> (i32, i32, i32) {
    %c0_i32 = arith.constant 0 : i32
    %c0_i32_0 = arith.constant 0 : i32
    %c0_i32_1 = arith.constant 0 : i32
    %c0_i32_2 = arith.constant 0 : i32
    return %c0_i32, %c0_i32_0, %c0_i32_1 : i32, i32, i32
  }
  func.func @transform_2(%arg0: i32) -> (i32, i32) {
    %c0_i32 = arith.constant 0 : i32
    %c0_i32_0 = arith.constant 0 : i32
    %c0_i32_1 = arith.constant 0 : i32
    return %c0_i32, %c0_i32_0 : i32, i32
  }
  func.func @transform_3(%arg0: i32) -> (i32, i32, i32) {
    %c0_i32 = arith.constant 0 : i32
    %c0_i32_0 = arith.constant 0 : i32
    %c0_i32_1 = arith.constant 0 : i32
    return %arg0, %c0_i32, %c0_i32_0 : i32, i32, i32
  }
}

</mosaic_0001>

<bundles_post_ra>
// kernel: crn_forward.1
= control target key start
LH: loop header
LB: loop body
LE: loop exit
PB: predicated region body
PF: predicated region fallthrough
CT: control target
= control target key end

     0   :  { %s3866_s12 = smov 0   ;;  %s5300_s0 = inlined_call_operand.vmem [shape: bf16[2,224,384], index: 0, kind: input, shape index: {}]   ;;  %s5301_s1 = inlined_call_operand.vmem [shape: bf16[7,96,224], index: 1, kind: input, shape index: {}]   ;;  %s5302_s2 = inlined_call_operand.vmem [shape: f32[96,3], index: 2, kind: input, shape index: {}]   ;;  %s5303_s3 = inlined_call_operand.vmem [shape: f32[2,1,256], index: 3, kind: output, shape index: {}]  }
   0x1 LB: > { %s3076_s13 = sadd.s32 4294967295, %s3834_s12   ;;  %p3080_p0 = scmp.ge.s32.totalorder %s3834_s12, 1  ;;  %s3834_s12 = sphi %s3866_s12, %s13_s12  }
   0x2   : > { %p137_p1 = scmp.lt.s32.totalorder %s3834_s12, 3 }
   0x4   : > { %p138_p2 = pnand %p3080_p0, %p137_p1 }
   0x5   : > { %v172_v0 = vld [vmem:[%s5302_s2 + $0x10] sm:$0xff] (!%p138_p2)  ;;  %v170_v1 = vld [vmem:[%s5302_s2] sm:$0xff] (!%p138_p2)  ;;  %p160_p3 = scmp.lt.s32.totalorder (!%p138_p2), %s3076_s13, 1  ;;  %v3836_v2 = vmov (!%p138_p2), 0   ;;  %v173_v3 = vld [vmem:[%s5302_s2 + $0x18] sm:$0xff] (!%p138_p2)  ;;  %s3837_s17 = smov (!%p138_p2), 109  }
   0x6   : > { %141 = sbr.rel (%p138_p2) target bundleno = 941 (0x3ad), region = 32  ;;  %3545 = vset.pattern.permute.xlu1 (!%p138_p2), %v3836_v2  ;;  %3544 = vset.pattern.permute.xlu0 (!%p138_p2), %v3836_v2  ;;  %v171_v4 = vld [vmem:[%s5302_s2 + $0x8] sm:$0xff] (!%p138_p2)  ;;  %v174_v6 = vld [vmem:[%s5302_s2 + $0x20] sm:$0xff] (!%p138_p2)  ;;  %v177_v7 = vld [vmem:[%s5302_s2 + $0x38] sm:$0xff] (!%p138_p2)  ;;  %s3838_s18 = smov (!%p138_p2), 90   ;;  %vm1664_vm0 = vcmask (!%p138_p2), 891904  }
   0x7   : > { %194 = vperm.xlu1 (!%p138_p2), %3545, %v172_v0   ;;  %184 = vperm.xlu0 (!%p138_p2), %3544, %v170_v1   ;;  %v175_v5 = vld [vmem:[%s5302_s2 + $0x28] sm:$0xff] (!%p138_p2)  ;;  %v176_v8 = vld [vmem:[%s5302_s2 + $0x30] sm:$0xff] (!%p138_p2)  ;;  %v178_v10 = vld [vmem:[%s5302_s2 + $0x40] sm:$0xff] (!%p138_p2)  ;;  %vm733_vm1 = vcmask (!%p138_p2), 736256   ;;  %s3839_s19 = smov (!%p138_p2), 52   ;;  %vm790_vm2 = vcmask (!%p138_p2), 785408  }
   0x8   : > { %v179_v9 = vld [vmem:[%s5302_s2 + $0x48] sm:$0xff] (!%p138_p2)  ;;  %v181_v11 = vld [vmem:[%s5302_s2 + $0x58] sm:$0xff] (!%p138_p2)  ;;  %v180_v12 = vld [vmem:[%s5302_s2 + $0x50] sm:$0xff] (!%p138_p2)  ;;  %s3840_s24 = smov (!%p138_p2), 33   ;;  %s3841_s25 = smov (!%p138_p2), 71   ;;  %vm1983_vm3 = vcmask (!%p138_p2), 424960  }
   0x9   : > { %vm2326_vm4 = vcmask (!%p138_p2), 269312   ;;  %vm1358_vm5 = vcmask (!%p138_p2), 580608   ;;  %vm2669_vm6 = vcmask (!%p138_p2), 113664  }
   0xb   : > { %199 = vperm.xlu1 (!%p138_p2), %3545, %v173_v3   ;;  %189 = vperm.xlu0 (!%p138_p2), %3544, %v171_v4  }
   0xd   : > { %s5305_s13 = smov (!%p160_p3, %s3076_s13), 1 }
   0xe   : > { %s3525_s22 = smul.u32 336, %s5305_s13  ;;  %s3082_s29 = sshll.u32 %s5305_s13, 1 }
   0xf   : > { %209 = vperm.xlu1 %3545, %v175_v5   ;;  %204 = vperm.xlu0 %3544, %v174_v6   ;;  %s168_s4 = scalar_lea.vmem %s5303_s3, %s3082_s29 }
  0x10   : > { %s3895_s27 = scalar_lea.vmem %s5300_s0, %s3525_s22 }
  0x11   : > { %v3919_v13 = vld [vmem:[%s3895_s27 + $0x8] ss:$12 sps:$4 sm:$0xff]   ;;  %v3922_v14 = vld [vmem:[%s3895_s27 + $0x4] ss:$12 sps:$4 sm:$0xff]   ;;  %v3932_v16 = vld [vmem:[%s3895_s27] ss:$12 sps:$4 sm:$0xff]  }
  0x12   : > { %v3925_v15 = vld [vmem:[%s3895_s27 + $0x1c] ss:$12 sps:$4 sm:$0xff]   ;;  %v3939_v17 = vld [vmem:[%s3895_s27 + $0x18] ss:$12 sps:$4 sm:$0xff]   ;;  %v3942_v18 = vld [vmem:[%s3895_s27 + $0x20] ss:$12 sps:$4 sm:$0xff]  }
  0x13   : > { %219 = vperm.xlu1 %3545, %v177_v7   ;;  %214 = vperm.xlu0 %3544, %v176_v8   ;;  %v3945_v19 = vld [vmem:[%s3895_s27 + $0x38] ss:$12 sps:$4 sm:$0xff]   ;;  %v3952_v20 = vld [vmem:[%s3895_s27 + $0x34] ss:$12 sps:$4 sm:$0xff]   ;;  %v3955_v21 = vld [vmem:[%s3895_s27 + $0x30] ss:$12 sps:$4 sm:$0xff]  }
  0x14   : > { %v3962_v22 = vld [vmem:[%s3895_s27 + $0x4c] ss:$12 sps:$4 sm:$0xff]   ;;  %v3969_v23 = vld [vmem:[%s3895_s27 + $0x50] ss:$12 sps:$4 sm:$0xff]   ;;  %v3976_v24 = vld [vmem:[%s3895_s27 + $0x48] ss:$12 sps:$4 sm:$0xff]  }
  0x15   : > { %v3983_v25 = vld [vmem:[%s3895_s27 + $0x64] ss:$12 sps:$4 sm:$0xff]   ;;  %v3990_v26 = vld [vmem:[%s3895_s27 + $0x68] ss:$12 sps:$4 sm:$0xff]   ;;  %v3997_v27 = vld [vmem:[%s3895_s27 + $0x60] ss:$12 sps:$4 sm:$0xff]  }
  0x16   : > { %v4004_v28 = vld [vmem:[%s3895_s27 + $0x7c] ss:$12 sps:$4 sm:$0xff]   ;;  %v4011_v29 = vld [vmem:[%s3895_s27 + $0x80] ss:$12 sps:$4 sm:$0xff]   ;;  %v4018_v30 = vld [vmem:[%s3895_s27 + $0x78] ss:$12 sps:$4 sm:$0xff]  }
  0x17   : > { %229 = vperm.xlu1 %3545, %v179_v9   ;;  %224 = vperm.xlu0 %3544, %v178_v10   ;;  %v4029_v31 = vld [vmem:[%s3895_s27 + $0x94] ss:$12 sps:$4 sm:$0xff]   ;;  %v4036_v32 = vld [vmem:[%s3895_s27 + $0x98] ss:$12 sps:$4 sm:$0xff]   ;;  %v4043_v33 = vld [vmem:[%s3895_s27 + $0x90] ss:$12 sps:$4 sm:$0xff]  }
  0x18   : > { %v4050_v34 = vld [vmem:[%s3895_s27 + $0xac] ss:$12 sps:$4 sm:$0xff]   ;;  %v4057_v35 = vld [vmem:[%s3895_s27 + $0xb0] ss:$12 sps:$4 sm:$0xff]   ;;  %v4064_v36 = vld [vmem:[%s3895_s27 + $0xa8] ss:$12 sps:$4 sm:$0xff]  }
  0x19   : > { %v4071_v37 = vld [vmem:[%s3895_s27 + $0xc4] ss:$12 sps:$4 sm:$0xff]   ;;  %v4078_v38 = vld [vmem:[%s3895_s27 + $0xc8] ss:$12 sps:$4 sm:$0xff]   ;;  %v4085_v39 = vld [vmem:[%s3895_s27 + $0xc0] ss:$12 sps:$4 sm:$0xff]  }
  0x1a   : > { %v4092_v40 = vld [vmem:[%s3895_s27 + $0xdc] ss:$12 sps:$4 sm:$0xff]   ;;  %v4099_v41 = vld [vmem:[%s3895_s27 + $0xe0] ss:$12 sps:$4 sm:$0xff]   ;;  %v4106_v42 = vld [vmem:[%s3895_s27 + $0xd8] ss:$12 sps:$4 sm:$0xff]  }
  0x1b   : > { %239 = vperm.xlu1 %3545, %v181_v11   ;;  %234 = vperm.xlu0 %3544, %v180_v12   ;;  %v4113_v43 = vld [vmem:[%s3895_s27 + $0xf4] ss:$12 sps:$4 sm:$0xff]   ;;  %v4124_v46 = vld [vmem:[%s3895_s27 + $0xf8] ss:$12 sps:$4 sm:$0xff]   ;;  %v4135_v49 = vld [vmem:[%s3895_s27 + $0xf0] ss:$12 sps:$4 sm:$0xff]  }
  0x1c   : > { %v4146_v52 = vld [vmem:[%s3895_s27 + $0x10c] ss:$12 sps:$4 sm:$0xff]   ;;  %v4157_v55 = vld [vmem:[%s3895_s27 + $0x110] ss:$12 sps:$4 sm:$0xff]   ;;  %v4168_v58 = vld [vmem:[%s3895_s27 + $0x108] ss:$12 sps:$4 sm:$0xff]  }
  0x1d   : > { %v4179_v61 = vld [vmem:[%s3895_s27 + $0x124] ss:$12 sps:$4 sm:$0xff]   ;;  %v4187_v1 = vld [vmem:[%s3895_s27 + $0x128] ss:$12 sps:$4 sm:$0xff]   ;;  %v4195_v5 = vld [vmem:[%s3895_s27 + $0x120] ss:$12 sps:$4 sm:$0xff]  }
  0x1e   : > { %v4204_v10 = vld [vmem:[%s3895_s27 + $0x13c] ss:$12 sps:$4 sm:$0xff]  }
  0x1f   : > { %1584 = vrot.lane.b32.xlu1 %v3919_v13, %s3837_s17  ;;  %1582 = vrot.lane.b32.xlu0 %v3922_v14, %s3837_s17 }
  0x23   : > { %1588 = vrot.lane.b32.xlu1 %v3925_v15, %s3837_s17  ;;  %1580 = vrot.lane.b32.xlu0 %v3932_v16, %s3837_s17 }
  0x27   : > { %1586 = vrot.lane.b32.xlu1 %v3939_v17, %s3837_s17  ;;  %1590 = vrot.lane.b32.xlu0 %v3942_v18, %s3837_s17 }
  0x2b   : > { %1596 = vrot.lane.b32.xlu1 %v3945_v19, %s3837_s17  ;;  %1594 = vrot.lane.b32.xlu0 %v3952_v20, %s3837_s17 }
  0x2f   : > { %651 = vrot.lane.b32.xlu1 %v3922_v14, %s3838_s18  ;;  %1592 = vrot.lane.b32.xlu0 %v3955_v21, %s3837_s17 }
  0x33   : > { %1600 = vrot.lane.b32.xlu1 %v3962_v22, %s3837_s17  ;;  %653 = vrot.lane.b32.xlu0 %v3919_v13, %s3838_s18 }
  0x37   : > { %649 = vrot.lane.b32.xlu1 %v3932_v16, %s3838_s18  ;;  %1602 = vrot.lane.b32.xlu0 %v3969_v23, %s3837_s17 }
  0x3b   : > { %657 = vrot.lane.b32.xlu1 %v3925_v15, %s3838_s18  ;;  %1598 = vrot.lane.b32.xlu0 %v3976_v24, %s3837_s17 }
  0x3f   : > { %1606 = vrot.lane.b32.xlu1 %v3983_v25, %s3837_s17  ;;  %659 = vrot.lane.b32.xlu0 %v3942_v18, %s3838_s18 }
  0x43   : > { %655 = vrot.lane.b32.xlu1 %v3939_v17, %s3838_s18  ;;  %1608 = vrot.lane.b32.xlu0 %v3990_v26, %s3837_s17 }
  0x47   : > { %663 = vrot.lane.b32.xlu1 %v3952_v20, %s3838_s18  ;;  %1604 = vrot.lane.b32.xlu0 %v3997_v27, %s3837_s17 }
  0x4b   : > { %1612 = vrot.lane.b32.xlu1 %v4004_v28, %s3837_s17  ;;  %665 = vrot.lane.b32.xlu0 %v3945_v19, %s3838_s18 }
  0x4f   : > { %661 = vrot.lane.b32.xlu1 %v3955_v21, %s3838_s18  ;;  %1614 = vrot.lane.b32.xlu0 %v4011_v29, %s3837_s17 }
  0x53   : > { %669 = vrot.lane.b32.xlu1 %v3962_v22, %s3838_s18  ;;  %1610 = vrot.lane.b32.xlu0 %v4018_v30, %s3837_s17 }
  0x57   : > { %1618 = vrot.lane.b32.xlu1 %v4029_v31, %s3837_s17  ;;  %671 = vrot.lane.b32.xlu0 %v3969_v23, %s3838_s18 }
  0x5b   : > { %667 = vrot.lane.b32.xlu1 %v3976_v24, %s3838_s18  ;;  %1620 = vrot.lane.b32.xlu0 %v4036_v32, %s3837_s17 }
  0x5f   : > { %675 = vrot.lane.b32.xlu1 %v3983_v25, %s3838_s18  ;;  %1616 = vrot.lane.b32.xlu0 %v4043_v33, %s3837_s17 }
  0x63   : > { %1624 = vrot.lane.b32.xlu1 %v4050_v34, %s3837_s17  ;;  %677 = vrot.lane.b32.xlu0 %v3990_v26, %s3838_s18 }
  0x67   : > { %673 = vrot.lane.b32.xlu1 %v3997_v27, %s3838_s18  ;;  %1626 = vrot.lane.b32.xlu0 %v4057_v35, %s3837_s17 }
  0x6b   : > { %681 = vrot.lane.b32.xlu1 %v4004_v28, %s3838_s18  ;;  %1622 = vrot.lane.b32.xlu0 %v4064_v36, %s3837_s17 }
  0x6f   : > { %1630 = vrot.lane.b32.xlu1 %v4071_v37, %s3837_s17  ;;  %683 = vrot.lane.b32.xlu0 %v4011_v29, %s3838_s18 }
  0x73   : > { %679 = vrot.lane.b32.xlu1 %v4018_v30, %s3838_s18  ;;  %1632 = vrot.lane.b32.xlu0 %v4078_v38, %s3837_s17 }
  0x77   : > { %687 = vrot.lane.b32.xlu1 %v4029_v31, %s3838_s18  ;;  %1628 = vrot.lane.b32.xlu0 %v4085_v39, %s3837_s17 }
  0x7b   : > { %1636 = vrot.lane.b32.xlu1 %v4092_v40, %s3837_s17  ;;  %689 = vrot.lane.b32.xlu0 %v4036_v32, %s3838_s18 }
  0x7f   : > { %685 = vrot.lane.b32.xlu1 %v4043_v33, %s3838_s18  ;;  %1638 = vrot.lane.b32.xlu0 %v4099_v41, %s3837_s17 }
  0x83   : > { %693 = vrot.lane.b32.xlu1 %v4050_v34, %s3838_s18  ;;  %1634 = vrot.lane.b32.xlu0 %v4106_v42, %s3837_s17 }
  0x86   : > { %v4115_v44 = vpop.permute.xlu1 %194  ;;  %v4117_v45 = vpop.permute.xlu0 %184 }
  0x87   : > { %1642 = vrot.lane.b32.xlu1 %v4113_v43, %s3837_s17  ;;  %695 = vrot.lane.b32.xlu0 %v4057_v35, %s3838_s18 }
  0x8a   : > { %v4126_v47 = vpop.permute.xlu1 %199  ;;  %v4128_v48 = vpop.permute.xlu0 %189 }
  0x8b   : > { %691 = vrot.lane.b32.xlu1 %v4064_v36, %s3838_s18  ;;  %1644 = vrot.lane.b32.xlu0 %v4124_v46, %s3837_s17 }
  0x8e   : > { %v4137_v50 = vpop.permute.xlu1 %209  ;;  %v4139_v51 = vpop.permute.xlu0 %204 }
  0x8f   : > { %699 = vrot.lane.b32.xlu1 %v4071_v37, %s3838_s18  ;;  %1640 = vrot.lane.b32.xlu0 %v4135_v49, %s3837_s17 }
  0x92   : > { %v4148_v53 = vpop.permute.xlu1 %219  ;;  %v4150_v54 = vpop.permute.xlu0 %214 }
  0x93   : > { %1648 = vrot.lane.b32.xlu1 %v4146_v52, %s3837_s17  ;;  %701 = vrot.lane.b32.xlu0 %v4078_v38, %s3838_s18 }
  0x96   : > { %v4159_v56 = vpop.permute.xlu1 %229  ;;  %v4161_v57 = vpop.permute.xlu0 %224 }
  0x97   : > { %697 = vrot.lane.b32.xlu1 %v4085_v39, %s3838_s18  ;;  %1650 = vrot.lane.b32.xlu0 %v4157_v55, %s3837_s17 }
  0x9a   : > { %v4170_v59 = vpop.permute.xlu1 %239  ;;  %v4172_v60 = vpop.permute.xlu0 %234 }
  0x9b   : > { %705 = vrot.lane.b32.xlu1 %v4092_v40, %s3838_s18  ;;  %1646 = vrot.lane.b32.xlu0 %v4168_v58, %s3837_s17 }
  0x9e   : > { %v1585_v62 = vpop.permute.xlu1 %1584  ;;  %v1583_v63 = vpop.permute.xlu0 %1582 }
  0x9f   : > { %v1666_v0 = vsel %vm1664_vm0, %v1583_v63, %v1585_v62  ;;  %1654 = vrot.lane.b32.xlu1 %v4179_v61, %s3837_s17  ;;  %707 = vrot.lane.b32.xlu0 %v4099_v41, %s3838_s18 }
  0xa0   : > { %1739 = vmatprep.subr.bf16.mxu0 %v1666_v0 }
  0xa2   : > { %v1589_v2 = vpop.permute.xlu1 %1588  ;;  %v1581_v3 = vpop.permute.xlu0 %1580 }
  0xa3   : > { %v1665_v4 = vsel %vm1664_vm0, %v1581_v3, %v1583_v63  ;;  %703 = vrot.lane.b32.xlu1 %v4106_v42, %s3838_s18  ;;  %1656 = vrot.lane.b32.xlu0 %v4187_v1, %s3837_s17  ;;  %v4212_v63 = vld [vmem:[%s3895_s27 + $0x140] ss:$12 sps:$4 sm:$0xff]  }
  0xa4   : > { %1740 = vmatpush1.bf16.msra.mxu0 %v1665_v4  ;;  %v4220_v4 = vld [vmem:[%s3895_s27 + $0x138] ss:$12 sps:$4 sm:$0xff]  }
  0xa6   : > { %v1587_v6 = vpop.permute.xlu1 %1586  ;;  %v1591_v7 = vpop.permute.xlu0 %1590 }
  0xa7   : > { %v1668_v8 = vsel %vm1664_vm0, %v1589_v2, %v1591_v7  ;;  %v1667_v9 = vsel %vm1664_vm0, %v1587_v6, %v1589_v2  ;;  %711 = vrot.lane.b32.xlu1 %v4113_v43, %s3838_s18  ;;  %1652 = vrot.lane.b32.xlu0 %v4195_v5, %s3837_s17 }
  0xa8   : > { %1741 = vmatprep.subr.bf16.mxu0 %v1668_v8 }
  0xa9   : > { %1742 = vmatpush1.bf16.msra.mxu0 %v1667_v9 }
  0xaa   : > { %v1597_v11 = vpop.permute.xlu1 %1596  ;;  %v1595_v12 = vpop.permute.xlu0 %1594 }
  0xab   : > { %v1670_v62 = vsel %vm1664_vm0, %v1595_v12, %v1597_v11  ;;  %1660 = vrot.lane.b32.xlu1 %v4204_v10, %s3837_s17  ;;  %713 = vrot.lane.b32.xlu0 %v4124_v46, %s3838_s18 }
  0xac   : > { %1743 = vmatprep.subr.bf16.mxu0 %v1670_v62 }
  0xae   : > { %v652_v0 = vpop.permute.xlu1 %651  ;;  %v1593_v2 = vpop.permute.xlu0 %1592 }
  0xaf   : > { %v1669_v3 = vsel %vm1664_vm0, %v1593_v2, %v1595_v12  ;;  %709 = vrot.lane.b32.xlu1 %v4135_v49, %s3838_s18  ;;  %1662 = vrot.lane.b32.xlu0 %v4212_v63, %s3837_s17 }
  0xb0   : > { %1744 = vmatpush1.bf16.msra.mxu0 %v1669_v3 }
  0xb2   : > { %v1601_v6 = vpop.permute.xlu1 %1600  ;;  %v654_v7 = vpop.permute.xlu0 %653 }
  0xb3   : > { %v735_v8 = vsel %vm733_vm1, %v652_v0, %v654_v7  ;;  %717 = vrot.lane.b32.xlu1 %v4146_v52, %s3838_s18  ;;  %1658 = vrot.lane.b32.xlu0 %v4220_v4, %s3837_s17 }
  0xb4   : > { %809 = vmatprep.subr.bf16.mxu1 %v735_v8 }
  0xb6   : > { %v650_v9 = vpop.permute.xlu1 %649  ;;  %v1603_v11 = vpop.permute.xlu0 %1602 }
  0xb7   : > { %v734_v12 = vsel %vm733_vm1, %v650_v9, %v652_v0  ;;  %v1672_v62 = vsel %vm1664_vm0, %v1601_v6, %v1603_v11  ;;  %1901 = vrot.lane.b32.xlu1 %v3922_v14, %s3839_s19  ;;  %719 = vrot.lane.b32.xlu0 %v4157_v55, %s3838_s18  ;;  %v3608_v0 = vld [vmem:[%s5301_s1 + $0x64] ss:$8 sps:$4 sm:$0xff]  }
  0xb8   : > { %810 = vmatpush1.bf16.msra.mxu1 %v734_v12  ;;  %1745 = vmatprep.subr.bf16.mxu0 %v1672_v62 }
  0xb9   : > { %3255 = vmatprep.mubr.msk.bf16.mxu0 %vm790_vm2, %v3608_v0 }
  0xba   : > { %v658_v2 = vpop.permute.xlu1 %657  ;;  %v1599_v3 = vpop.permute.xlu0 %1598 }
  0xbb   : > { %v1671_v7 = vsel %vm1664_vm0, %v1599_v3, %v1601_v6  ;;  %715 = vrot.lane.b32.xlu1 %v4168_v58, %s3838_s18  ;;  %1903 = vrot.lane.b32.xlu0 %v3919_v13, %s3839_s19 }
  0xbc   : > { %1746 = vmatpush1.bf16.msra.mxu0 %v1671_v7 }
  0xbe   : > { %v1607_v8 = vpop.permute.xlu1 %1606  ;;  %v660_v9 = vpop.permute.xlu0 %659 }
  0xbf   : > { %v737_v11 = vsel %vm733_vm1, %v658_v2, %v660_v9  ;;  %723 = vrot.lane.b32.xlu1 %v4179_v61, %s3838_s18  ;;  %1899 = vrot.lane.b32.xlu0 %v3932_v16, %s3839_s19 }
  0xc0   : > { %811 = vmatprep.subr.bf16.mxu1 %v737_v11 }
  0xc2   : > { %v656_v6 = vpop.permute.xlu1 %655  ;;  %v1609_v12 = vpop.permute.xlu0 %1608 }
  0xc3   : > { %v736_v62 = vsel %vm733_vm1, %v656_v6, %v658_v2  ;;  %v1674_v3 = vsel %vm1664_vm0, %v1607_v8, %v1609_v12  ;;  %1907 = vrot.lane.b32.xlu1 %v3925_v15, %s3839_s19  ;;  %725 = vrot.lane.b32.xlu0 %v4187_v1, %s3838_s18 }
  0xc4   : > { %812 = vmatpush1.bf16.msra.mxu1 %v736_v62  ;;  %1747 = vmatprep.subr.bf16.mxu0 %v1674_v3 }
  0xc6   : > { %v664_v7 = vpop.permute.xlu1 %663  ;;  %v1605_v9 = vpop.permute.xlu0 %1604 }
  0xc7   : > { %v1673_v11 = vsel %vm1664_vm0, %v1605_v9, %v1607_v8  ;;  %721 = vrot.lane.b32.xlu1 %v4195_v5, %s3838_s18  ;;  %1909 = vrot.lane.b32.xlu0 %v3942_v18, %s3839_s19 }
  0xc8   : > { %1748 = vmatpush1.bf16.msra.mxu0 %v1673_v11 }
  0xca   : > { %v1613_v2 = vpop.permute.xlu1 %1612  ;;  %v666_v0 = vpop.permute.xlu0 %665 }
  0xcb   : > { %v739_v6 = vsel %vm733_vm1, %v664_v7, %v666_v0  ;;  %729 = vrot.lane.b32.xlu1 %v4204_v10, %s3838_s18  ;;  %1905 = vrot.lane.b32.xlu0 %v3939_v17, %s3839_s19 }
  0xcc   : > { %813 = vmatprep.subr.bf16.mxu1 %v739_v6 }
  0xce   : > { %v662_v12 = vpop.permute.xlu1 %661  ;;  %v1615_v8 = vpop.permute.xlu0 %1614 }
  0xcf   : > { %v738_v62 = vsel %vm733_vm1, %v662_v12, %v664_v7  ;;  %v1676_v3 = vsel %vm1664_vm0, %v1613_v2, %v1615_v8  ;;  %1913 = vrot.lane.b32.xlu1 %v3952_v20, %s3839_s19  ;;  %731 = vrot.lane.b32.xlu0 %v4212_v63, %s3838_s18 }
  0xd0   : > { %814 = vmatpush1.bf16.msra.mxu1 %v738_v62  ;;  %1749 = vmatprep.subr.bf16.mxu0 %v1676_v3 }
  0xd2   : > { %v670_v9 = vpop.permute.xlu1 %669  ;;  %v1611_v11 = vpop.permute.xlu0 %1610 }
  0xd3   : > { %v1675_v0 = vsel %vm1664_vm0, %v1611_v11, %v1613_v2  ;;  %727 = vrot.lane.b32.xlu1 %v4220_v4, %s3838_s18  ;;  %1915 = vrot.lane.b32.xlu0 %v3945_v19, %s3839_s19 }
  0xd4   : > { %1750 = vmatpush1.bf16.msra.mxu0 %v1675_v0 }
  0xd6   : > { %v1619_v7 = vpop.permute.xlu1 %1618  ;;  %v672_v6 = vpop.permute.xlu0 %671 }
  0xd7   : > { %v741_v12 = vsel %vm733_vm1, %v670_v9, %v672_v6  ;;  %1919 = vrot.lane.b32.xlu1 %v3962_v22, %s3839_s19  ;;  %1911 = vrot.lane.b32.xlu0 %v3955_v21, %s3839_s19 }
  0xd8   : > { %815 = vmatprep.subr.bf16.mxu1 %v741_v12 }
  0xda   : > { %v668_v8 = vpop.permute.xlu1 %667  ;;  %v1621_v2 = vpop.permute.xlu0 %1620 }
  0xdb   : > { %v740_v62 = vsel %vm733_vm1, %v668_v8, %v670_v9  ;;  %v1678_v3 = vsel %vm1664_vm0, %v1619_v7, %v1621_v2  ;;  %1917 = vrot.lane.b32.xlu1 %v3976_v24, %s3839_s19  ;;  %1921 = vrot.lane.b32.xlu0 %v3969_v23, %s3839_s19 }
  0xdc   : > { %816 = vmatpush1.bf16.msra.mxu1 %v740_v62  ;;  %1751 = vmatprep.subr.bf16.mxu0 %v1678_v3 }
  0xde   : > { %v676_v11 = vpop.permute.xlu1 %675  ;;  %v1617_v0 = vpop.permute.xlu0 %1616 }
  0xdf   : > { %v1677_v6 = vsel %vm1664_vm0, %v1617_v0, %v1619_v7  ;;  %1927 = vrot.lane.b32.xlu1 %v3990_v26, %s3839_s19  ;;  %1925 = vrot.lane.b32.xlu0 %v3983_v25, %s3839_s19 }
  0xe0   : > { %1752 = vmatpush1.bf16.msra.mxu0 %v1677_v6 }
  0xe2   : > { %v1625_v9 = vpop.permute.xlu1 %1624  ;;  %v678_v12 = vpop.permute.xlu0 %677 }
  0xe3   : > { %v743_v8 = vsel %vm733_vm1, %v676_v11, %v678_v12  ;;  %1931 = vrot.lane.b32.xlu1 %v4004_v28, %s3839_s19  ;;  %1923 = vrot.lane.b32.xlu0 %v3997_v27, %s3839_s19 }
  0xe4   : > { %817 = vmatprep.subr.bf16.mxu1 %v743_v8 }
  0xe6   : > { %v674_v2 = vpop.permute.xlu1 %673  ;;  %v1627_v7 = vpop.permute.xlu0 %1626 }
  0xe7   : > { %v742_v62 = vsel %vm733_vm1, %v674_v2, %v676_v11  ;;  %v1680_v3 = vsel %vm1664_vm0, %v1625_v9, %v1627_v7  ;;  %1929 = vrot.lane.b32.xlu1 %v4018_v30, %s3839_s19  ;;  %1933 = vrot.lane.b32.xlu0 %v4011_v29, %s3839_s19 }
  0xe8   : > { %818 = vmatpush1.bf16.msra.mxu1 %v742_v62  ;;  %1753 = vmatprep.subr.bf16.mxu0 %v1680_v3 }
  0xea   : > { %v682_v0 = vpop.permute.xlu1 %681  ;;  %v1623_v6 = vpop.permute.xlu0 %1622 }
  0xeb   : > { %v1679_v12 = vsel %vm1664_vm0, %v1623_v6, %v1625_v9  ;;  %1939 = vrot.lane.b32.xlu1 %v4036_v32, %s3839_s19  ;;  %1937 = vrot.lane.b32.xlu0 %v4029_v31, %s3839_s19 }
  0xec   : > { %1754 = vmatpush1.bf16.msra.mxu0 %v1679_v12 }
  0xee   : > { %v1631_v11 = vpop.permute.xlu1 %1630  ;;  %v684_v8 = vpop.permute.xlu0 %683 }
  0xef   : > { %v745_v2 = vsel %vm733_vm1, %v682_v0, %v684_v8  ;;  %1943 = vrot.lane.b32.xlu1 %v4050_v34, %s3839_s19  ;;  %1935 = vrot.lane.b32.xlu0 %v4043_v33, %s3839_s19 }
  0xf0   : > { %819 = vmatprep.subr.bf16.mxu1 %v745_v2 }
  0xf2   : > { %v680_v7 = vpop.permute.xlu1 %679  ;;  %v1633_v9 = vpop.permute.xlu0 %1632 }
  0xf3   : > { %v744_v62 = vsel %vm733_vm1, %v680_v7, %v682_v0  ;;  %v1682_v3 = vsel %vm1664_vm0, %v1631_v11, %v1633_v9  ;;  %1941 = vrot.lane.b32.xlu1 %v4064_v36, %s3839_s19  ;;  %1945 = vrot.lane.b32.xlu0 %v4057_v35, %s3839_s19  ;;  %v3614_v0 = vld [vmem:[%s5301_s1 + $0xc4] ss:$8 sps:$4 sm:$0xff]  }
  0xf4   : > { %820 = vmatpush1.bf16.msra.mxu1 %v744_v62  ;;  %1755 = vmatprep.subr.bf16.mxu0 %v1682_v3 }
  0xf5   : > { %3161 = vmatprep.mubr.msk.bf16.mxu1 %vm790_vm2, %v3614_v0 }
  0xf6   : > { %v688_v6 = vpop.permute.xlu1 %687  ;;  %v1629_v12 = vpop.permute.xlu0 %1628 }
  0xf7   : > { %v1681_v8 = vsel %vm1664_vm0, %v1629_v12, %v1631_v11  ;;  %1951 = vrot.lane.b32.xlu1 %v4078_v38, %s3839_s19  ;;  %1949 = vrot.lane.b32.xlu0 %v4071_v37, %s3839_s19 }
  0xf8   : > { %1756 = vmatpush1.bf16.msra.mxu0 %v1681_v8 }
  0xfa   : > { %v1637_v2 = vpop.permute.xlu1 %1636  ;;  %v690_v7 = vpop.permute.xlu0 %689 }
  0xfb   : > { %v747_v9 = vsel %vm733_vm1, %v688_v6, %v690_v7  ;;  %1955 = vrot.lane.b32.xlu1 %v4092_v40, %s3839_s19  ;;  %1947 = vrot.lane.b32.xlu0 %v4085_v39, %s3839_s19 }
  0xfc   : > { %821 = vmatprep.subr.bf16.mxu1 %v747_v9 }
  0xfe   : > { %v686_v11 = vpop.permute.xlu1 %685  ;;  %v1639_v62 = vpop.permute.xlu0 %1638 }
  0xff   : > { %v746_v3 = vsel %vm733_vm1, %v686_v11, %v688_v6  ;;  %v1684_v12 = vsel %vm1664_vm0, %v1637_v2, %v1639_v62  ;;  %1953 = vrot.lane.b32.xlu1 %v4106_v42, %s3839_s19  ;;  %1957 = vrot.lane.b32.xlu0 %v4099_v41, %s3839_s19 }
 0x100   : > { %822 = vmatpush1.bf16.msra.mxu1 %v746_v3  ;;  %1757 = vmatprep.subr.bf16.mxu0 %v1684_v12 }
 0x102   : > { %v694_v8 = vpop.permute.xlu1 %693  ;;  %v1635_v0 = vpop.permute.xlu0 %1634 }
 0x103   : > { %v1683_v7 = vsel %vm1664_vm0, %v1635_v0, %v1637_v2  ;;  %1963 = vrot.lane.b32.xlu1 %v4124_v46, %s3839_s19  ;;  %1961 = vrot.lane.b32.xlu0 %v4113_v43, %s3839_s19 }
 0x104   : > { %1758 = vmatpush1.bf16.msra.mxu0 %v1683_v7 }
 0x106   : > { %v1643_v6 = vpop.permute.xlu1 %1642  ;;  %v696_v9 = vpop.permute.xlu0 %695 }
 0x107   : > { %v749_v42 = vsel %vm733_vm1, %v694_v8, %v696_v9  ;;  %1967 = vrot.lane.b32.xlu1 %v4146_v52, %s3839_s19  ;;  %1959 = vrot.lane.b32.xlu0 %v4135_v49, %s3839_s19 }
 0x108   : > { %823 = vmatprep.subr.bf16.mxu1 %v749_v42 }
 0x10a   : > { %v692_v11 = vpop.permute.xlu1 %691  ;;  %v1645_v2 = vpop.permute.xlu0 %1644 }
 0x10b   : > { %v748_v62 = vsel %vm733_vm1, %v692_v11, %v694_v8  ;;  %v1686_v46 = vsel %vm1664_vm0, %v1643_v6, %v1645_v2  ;;  %1965 = vrot.lane.b32.xlu1 %v4168_v58, %s3839_s19  ;;  %1969 = vrot.lane.b32.xlu0 %v4157_v55, %s3839_s19 }
 0x10c   : > { %824 = vmatpush1.bf16.msra.mxu1 %v748_v62  ;;  %1759 = vmatprep.subr.bf16.mxu0 %v1686_v46 }
 0x10e   : > { %v700_v43 = vpop.permute.xlu1 %699  ;;  %v1641_v52 = vpop.permute.xlu0 %1640 }
 0x10f   : > { %v1685_v3 = vsel %vm1664_vm0, %v1641_v52, %v1643_v6  ;;  %1975 = vrot.lane.b32.xlu1 %v4187_v1, %s3839_s19  ;;  %1973 = vrot.lane.b32.xlu0 %v4179_v61, %s3839_s19 }
 0x110   : > { %1760 = vmatpush1.bf16.msra.mxu0 %v1685_v3 }
 0x112   : > { %v1649_v49 = vpop.permute.xlu1 %1648  ;;  %v702_v12 = vpop.permute.xlu0 %701 }
 0x113   : > { %v751_v58 = vsel %vm733_vm1, %v700_v43, %v702_v12  ;;  %1979 = vrot.lane.b32.xlu1 %v4204_v10, %s3839_s19  ;;  %1971 = vrot.lane.b32.xlu0 %v4195_v5, %s3839_s19  ;;  %v3606_v12 = vld [vmem:[%s5301_s1 + $0x60] ss:$8 sps:$4 sm:$0xff]  }
 0x114   : > { %825 = vmatprep.subr.bf16.mxu1 %v751_v58 }
 0x116   : > { %v698_v55 = vpop.permute.xlu1 %697  ;;  %v1651_v8 = vpop.permute.xlu0 %1650 }
 0x117   : > { %v750_v0 = vsel %vm733_vm1, %v698_v55, %v700_v43  ;;  %v1688_v1 = vsel %vm1664_vm0, %v1649_v49, %v1651_v8  ;;  %1977 = vrot.lane.b32.xlu1 %v4220_v4, %s3839_s19  ;;  %1981 = vrot.lane.b32.xlu0 %v4212_v63, %s3839_s19  ;;  %v4414_v8 = vld [vmem:[%s3895_s27 + $0x1c] ss:$12 sps:$4 sm:$0xff]  }
 0x118   : > { %826 = vmatpush1.bf16.msra.mxu1 %v750_v0  ;;  %1761 = vmatprep.subr.bf16.mxu0 %v1688_v1 }
 0x11a   : > { %v706_v61 = vpop.permute.xlu1 %705  ;;  %v1647_v10 = vpop.permute.xlu0 %1646 }
 0x11b   : > { %v1687_v7 = vsel %vm1664_vm0, %v1647_v10, %v1649_v49  ;;  %2246 = vrot.lane.b32.xlu1 %v3919_v13, %s3840_s24  ;;  %2244 = vrot.lane.b32.xlu0 %v3922_v14, %s3840_s24 }
 0x11c   : > { %1762 = vmatpush1.bf16.msra.mxu0 %v1687_v7 }
 0x11e   : > { %v1655_v5 = vpop.permute.xlu1 %1654  ;;  %v708_v6 = vpop.permute.xlu0 %707 }
 0x11f   : > { %v753_v4 = vsel %vm733_vm1, %v706_v61, %v708_v6  ;;  %2250 = vrot.lane.b32.xlu1 %v3925_v15, %s3840_s24  ;;  %2242 = vrot.lane.b32.xlu0 %v3932_v16, %s3840_s24  ;;  %v4435_v6 = vld [vmem:[%s3895_s27 + $0x18] ss:$12 sps:$4 sm:$0xff]  }
 0x120   : > { %827 = vmatprep.subr.bf16.mxu1 %v753_v4 }
 0x122   : > { %v704_v63 = vpop.permute.xlu1 %703  ;;  %v1657_v9 = vpop.permute.xlu0 %1656 }
 0x123   : > { %v752_v42 = vsel %vm733_vm1, %v704_v63, %v706_v61  ;;  %v1690_v11 = vsel %vm1664_vm0, %v1655_v5, %v1657_v9  ;;  %2248 = vrot.lane.b32.xlu1 %v3939_v17, %s3840_s24  ;;  %2252 = vrot.lane.b32.xlu0 %v3942_v18, %s3840_s24  ;;  %v3611_v61 = vld [vmem:[%s5301_s1 + $0x70] ss:$8 sps:$4 sm:$0xff]   ;;  %v4444_v63 = vld [vmem:[%s3895_s27 + $0x34] ss:$12 sps:$4 sm:$0xff]  }
 0x124   : > { %828 = vmatpush1.bf16.msra.mxu1 %v752_v42  ;;  %1763 = vmatprep.subr.bf16.mxu0 %v1690_v11  ;;  %v3623_v9 = vld [vmem:[%s5301_s1 + $0x80] ss:$8 sps:$4 sm:$0xff]  }
 0x126   : > { %v712_v2 = vpop.permute.xlu1 %711  ;;  %v1653_v15 = vpop.permute.xlu0 %1652 }
 0x127   : > { %v1689_v62 = vsel %vm1664_vm0, %v1653_v15, %v1655_v5  ;;  %2258 = vrot.lane.b32.xlu1 %v3945_v19, %s3840_s24  ;;  %2256 = vrot.lane.b32.xlu0 %v3952_v20, %s3840_s24 }
 0x128   : > { %1764 = vmatpush1.bf16.msra.mxu0 %v1689_v62  ;;  %v4461_v62 = vld [vmem:[%s3895_s27 + $0x38] ss:$12 sps:$4 sm:$0xff]  }
 0x12a   : > { %v1661_v46 = vpop.permute.xlu1 %1660  ;;  %v714_v43 = vpop.permute.xlu0 %713 }
 0x12b   : > { %v755_v17 = vsel %vm733_vm1, %v712_v2, %v714_v43  ;;  %1276 = vrot.lane.b32.xlu1 %v3922_v14, %s3841_s25  ;;  %2254 = vrot.lane.b32.xlu0 %v3955_v21, %s3840_s24 }
 0x12c   : > { %829 = vmatprep.subr.bf16.mxu1 %v755_v17  ;;  %v4468_v17 = vld [vmem:[%s3895_s27 + $0x30] ss:$12 sps:$4 sm:$0xff]  }
 0x12e   : > { %v710_v52 = vpop.permute.xlu1 %709  ;;  %v1663_v3 = vpop.permute.xlu0 %1662 }
 0x12f   : > { %v754_v19 = vsel %vm733_vm1, %v710_v52, %v712_v2  ;;  %v1692_v49 = vsel %vm1664_vm0, %v1661_v46, %v1663_v3  ;;  %2262 = vrot.lane.b32.xlu1 %v3962_v22, %s3840_s24  ;;  %1278 = vrot.lane.b32.xlu0 %v3919_v13, %s3841_s25  ;;  %v3609_v13 = vld [vmem:[%s5301_s1 + $0x74] ss:$8 sps:$4 sm:$0xff]   ;;  %v3642_v52 = vld [vmem:[%s5301_s1 + $0xa4] ss:$8 sps:$4 sm:$0xff]  }
 0x130   : > { %830 = vmatpush1.bf16.msra.mxu1 %v754_v19  ;;  %1765 = vmatprep.subr.bf16.mxu0 %v1692_v49 }
 0x132   : > { %v718_v14 = vpop.permute.xlu1 %717  ;;  %v1659_v20 = vpop.permute.xlu0 %1658 }
 0x133   : > { %v1691_v21 = vsel %vm1664_vm0, %v1659_v20, %v1661_v46  ;;  %1274 = vrot.lane.b32.xlu1 %v3932_v16, %s3841_s25  ;;  %2264 = vrot.lane.b32.xlu0 %v3969_v23, %s3840_s24 }
 0x134   : > { %1766 = vmatpush1.bf16.msra.mxu0 %v1691_v21 }
 0x136   : > { %v1902_v22 = vpop.permute.xlu1 %1901  ;;  %v720_v58 = vpop.permute.xlu0 %719 }
 0x137   : > { %v757_v55 = vsel %vm733_vm1, %v718_v14, %v720_v58  ;;  %1772 = vmatmul.mubr.bf16.vlgmr.msra.gmra.mrb[0].mxu0 %v3606_v12  ;;  %1282 = vrot.lane.b32.xlu1 %v4414_v8, %s3841_s25  ;;  %v3615_v58 = vld [vmem:[%s3895_s27] ss:$12 sps:$4 sm:$0xff]  }
 0x138   : > { %831 = vmatprep.subr.bf16.mxu1 %v757_v55  ;;  %2260 = vrot.lane.b32.xlu0 %v3976_v24, %s3840_s24  ;;  %v3621_v24 = vld [vmem:[%s5301_s1 + $0x84] ss:$8 sps:$4 sm:$0xff]   ;;  %v3620_v55 = vld [vmem:[%s3895_s27 + $0x1c] ss:$12 sps:$4 sm:$0xff]  }
 0x139   : > { %3256 = vmatprep.mubr.msk.bf16.mxu0 %vm790_vm2, %v3609_v13 }
 0x13a   : > { %v716_v16 = vpop.permute.xlu1 %715  ;;  %v1904_v23 = vpop.permute.xlu0 %1903 }
 0x13b   : > { %v756_v0 = vsel %vm733_vm1, %v716_v16, %v718_v14  ;;  %v1985_v1 = vsel %vm1983_vm3, %v1902_v22, %v1904_v23  ;;  %2268 = vrot.lane.b32.xlu1 %v3983_v25, %s3840_s24  ;;  %v4482_v14 = vld [vmem:[%s3895_s27 + $0x4c] ss:$12 sps:$4 sm:$0xff]  }
 0x13c   : > { %832 = vmatpush1.bf16.msra.mxu1 %v756_v0  ;;  %2058 = vmatprep.subr.bf16.mxu0 %v1985_v1  ;;  %v3644_v0 = vld [vmem:[%s5301_s1 + $0xa0] ss:$8 sps:$4 sm:$0xff]  }
 0x13d   : > { %1284 = vrot.lane.b32.xlu0 %v3942_v18, %s3841_s25 }
 0x13e   : > { %v724_v10 = vpop.permute.xlu1 %723  ;;  %v1900_v7 = vpop.permute.xlu0 %1899 }
 0x13f   : > { %v1984_v5 = vsel %vm1983_vm3, %v1900_v7, %v1902_v22  ;;  %1280 = vrot.lane.b32.xlu1 %v4435_v6, %s3841_s25  ;;  %1782 = vmatmul.mubr.bf16.gmra.mrb[4].mxu0 %v3611_v61  ;;  %v3612_v22 = vld [vmem:[%s5301_s1 + $0xc0] ss:$8 sps:$4 sm:$0xff]  }
 0x140   : > { %2059 = vmatpush1.bf16.msra.mxu0 %v1984_v5  ;;  %3257 = vmatprep.mubr.msk.bf16.mxu0 %vm790_vm2, %v3621_v24  ;;  %v4512_v61 = vld [vmem:[%s3895_s27 + $0x48] ss:$12 sps:$4 sm:$0xff]  }
 0x141   : > { %2270 = vrot.lane.b32.xlu0 %v3990_v26, %s3840_s24  ;;  %v3630_v26 = vld [vmem:[%s5301_s1 + $0x94] ss:$8 sps:$4 sm:$0xff]  }
 0x142   : > { %v1908_v25 = vpop.permute.xlu1 %1907  ;;  %v726_v4 = vpop.permute.xlu0 %725  ;;  %v3654_v24 = vld [vmem:[%s5301_s1 + $0xb4] ss:$8 sps:$4 sm:$0xff]  }
 0x143   : > { %v759_v18 = vsel %vm733_vm1, %v724_v10, %v726_v4  ;;  %1288 = vrot.lane.b32.xlu1 %v4444_v63, %s3841_s25 }
 0x144   : > { %833 = vmatprep.subr.bf16.mxu1 %v759_v18 }
 0x145   : > { %2266 = vrot.lane.b32.xlu0 %v3997_v27, %s3840_s24 }
 0x146   : > { %v722_v42 = vpop.permute.xlu1 %721  ;;  %v1910_v11 = vpop.permute.xlu0 %1909 }
 0x147   : > { %v758_v2 = vsel %vm733_vm1, %v722_v42, %v724_v10  ;;  %v1987_v15 = vsel %vm1983_vm3, %v1908_v25, %v1910_v11  ;;  %2274 = vrot.lane.b32.xlu1 %v4004_v28, %s3840_s24  ;;  %1792 = vmatmul.mubr.bf16.gmra.mrb[8].mxu0 %v3623_v9  ;;  %v3632_v28 = vld [vmem:[%s5301_s1 + $0x90] ss:$8 sps:$4 sm:$0xff]  }
 0x148   : > { %834 = vmatpush1.bf16.msra.mxu1 %v758_v2  ;;  %2060 = vmatprep.subr.bf16.mxu0 %v1987_v15  ;;  %v3618_v10 = vld [vmem:[%s3895_s27 + $0x18] ss:$12 sps:$4 sm:$0xff]  }
 0x149   : > { %1290 = vrot.lane.b32.xlu0 %v4461_v62, %s3841_s25  ;;  %3258 = vmatprep.mubr.msk.bf16.mxu0 %vm790_vm2, %v3630_v26  ;;  %v4527_v9 = vld [vmem:[%s3895_s27 + $0x64] ss:$12 sps:$4 sm:$0xff]   ;;  %v3629_v42 = vld [vmem:[%s3895_s27 + $0x4c] ss:$12 sps:$4 sm:$0xff]  }
 0x14a   : > { %v730_v27 = vpop.permute.xlu1 %729  ;;  %v1906_v46 = vpop.permute.xlu0 %1905  ;;  %v3624_v26 = vld [vmem:[%s3895_s27 + $0x30] ss:$12 sps:$4 sm:$0xff]   ;;  %v3648_v15 = vld [vmem:[%s5301_s1 + $0xe4] ss:$8 sps:$4 sm:$0xff]  }
 0x14b   : > { %v1986_v43 = vsel %vm1983_vm3, %v1906_v46, %v1908_v25  ;;  %1286 = vrot.lane.b32.xlu1 %v4468_v17, %s3841_s25  ;;  %v3626_v25 = vld [vmem:[%s3895_s27 + $0x34] ss:$12 sps:$4 sm:$0xff]  }
 0x14c   : > { %2061 = vmatpush1.bf16.msra.mxu0 %v1986_v43  ;;  %v3627_v43 = vld [vmem:[%s3895_s27 + $0x48] ss:$12 sps:$4 sm:$0xff]  }
 0x14d   : > { %2276 = vrot.lane.b32.xlu0 %v4011_v29, %s3840_s24  ;;  %v3617_v29 = vld [vmem:[%s3895_s27 + $0x4] ss:$12 sps:$4 sm:$0xff]  }
 0x14e   : > { %v1914_v3 = vpop.permute.xlu1 %1913  ;;  %v732_v19 = vpop.permute.xlu0 %731 }
 0x14f   : > { %v761_v49 = vsel %vm733_vm1, %v730_v27, %v732_v19  ;;  %1294 = vrot.lane.b32.xlu1 %v4482_v14, %s3841_s25  ;;  %1802 = vmatmul.mubr.bf16.gmra.mrb[12].mxu0 %v3632_v28  ;;  %v4553_v28 = vld [vmem:[%s3895_s27 + $0x68] ss:$12 sps:$4 sm:$0xff]  }
 0x150   : > { %835 = vmatprep.subr.bf16.mxu1 %v761_v49  ;;  %3259 = vmatprep.mubr.msk.bf16.mxu0 %vm790_vm2, %v3642_v52  ;;  %v3635_v52 = vld [vmem:[%s3895_s27 + $0x64] ss:$12 sps:$4 sm:$0xff]   ;;  %v4561_v49 = vld [vmem:[%s3895_s27 + $0x60] ss:$12 sps:$4 sm:$0xff]  }
 0x151   : > { %2272 = vrot.lane.b32.xlu0 %v4018_v30, %s3840_s24  ;;  %v4499_v30 = vld [vmem:[%s3895_s27 + $0x50] ss:$12 sps:$4 sm:$0xff]  }
 0x152   : > { %v728_v20 = vpop.permute.xlu1 %727  ;;  %v1916_v21 = vpop.permute.xlu0 %1915 }
 0x153   : > { %v760_v12 = vsel %vm733_vm1, %v728_v20, %v730_v27  ;;  %v1989_v13 = vsel %vm1983_vm3, %v1914_v3, %v1916_v21  ;;  %2280 = vrot.lane.b32.xlu1 %v4029_v31, %s3840_s24  ;;  %v3636_v31 = vld [vmem:[%s5301_s1 + $0xd4] ss:$8 sps:$4 sm:$0xff]   ;;  %v3656_v27 = vld [vmem:[%s5301_s1 + $0xb0] ss:$8 sps:$4 sm:$0xff]   ;;  %v3633_v20 = vld [vmem:[%s3895_s27 + $0x60] ss:$12 sps:$4 sm:$0xff]  }
 0x154   : > { %836 = vmatpush1.bf16.msra.mxu1 %v760_v12  ;;  %2062 = vmatprep.subr.bf16.mxu0 %v1989_v13  ;;  %v3641_v13 = vld [vmem:[%s3895_s27 + $0x7c] ss:$12 sps:$4 sm:$0xff]  }
 0x155   : > { %1296 = vrot.lane.b32.xlu0 %v4499_v30, %s3841_s25  ;;  %1114 = vmatprep.subr.bf16.mxu1 %v3617_v29  ;;  %v3650_v29 = vld [vmem:[%s5301_s1 + $0xe0] ss:$8 sps:$4 sm:$0xff]  }
 0x156   : > { %v1920_v16 = vpop.permute.xlu1 %1919  ;;  %v1912_v23 = vpop.permute.xlu0 %1911 }
 0x157   : > { %v1988_v1 = vsel %vm1983_vm3, %v1912_v23, %v1914_v3  ;;  %1292 = vrot.lane.b32.xlu1 %v4512_v61, %s3841_s25  ;;  %842 = vmatmul.mubr.bf16.vlgmr.msra.gmra.mrb[0].mxu1 %v3612_v22  ;;  %v3660_v22 = vld [vmem:[%s5301_s1 + $0xf4] ss:$8 sps:$4 sm:$0xff]  }
 0x158   : > { %2063 = vmatpush1.bf16.msra.mxu0 %v1988_v1  ;;  %1115 = vmatpush1.bf16.msra.mxu1 %v3615_v58  ;;  %v3647_v23 = vld [vmem:[%s3895_s27 + $0x94] ss:$12 sps:$4 sm:$0xff]  }
 0x159   : > { %2282 = vrot.lane.b32.xlu0 %v4036_v32, %s3840_s24  ;;  %1116 = vmatprep.subr.bf16.mxu1 %v3620_v55  ;;  %v3638_v32 = vld [vmem:[%s5301_s1 + $0xd0] ss:$8 sps:$4 sm:$0xff]  }
 0x15a   : > { %v1918_v7 = vpop.permute.xlu1 %1917  ;;  %v1922_v5 = vpop.permute.xlu0 %1921  ;;  %3162 = vmatprep.mubr.msk.bf16.mxu1 %vm790_vm2, %v3636_v31  ;;  %1812 = vmatmul.mubr.bf16.gmra.mrb[16].mxu0 %v3644_v0 }
 0x15b   : > { %v1990_v4 = vsel %vm1983_vm3, %v1918_v7, %v1920_v16  ;;  %v1991_v18 = vsel %vm1983_vm3, %v1920_v16, %v1922_v5  ;;  %1300 = vrot.lane.b32.xlu1 %v4527_v9, %s3841_s25  ;;  %3260 = vmatprep.mubr.msk.bf16.mxu0 %vm790_vm2, %v3654_v24  ;;  %v4579_v16 = vld [vmem:[%s3895_s27 + $0x7c] ss:$12 sps:$4 sm:$0xff]   ;;  %v3662_v24 = vld [vmem:[%s5301_s1 + $0xf0] ss:$8 sps:$4 sm:$0xff]  }
 0x15c   : > { %2064 = vmatprep.subr.bf16.mxu0 %v1991_v18  ;;  %1117 = vmatpush1.bf16.msra.mxu1 %v3618_v10  ;;  %v4596_v10 = vld [vmem:[%s3895_s27 + $0x80] ss:$12 sps:$4 sm:$0xff]   ;;  %v4606_v18 = vld [vmem:[%s3895_s27 + $0x78] ss:$12 sps:$4 sm:$0xff]  }
 0x15d   : > { %2065 = vmatpush1.bf16.msra.mxu0 %v1990_v4  ;;  %2278 = vrot.lane.b32.xlu0 %v4043_v33, %s3840_s24  ;;  %v3668_v33 = vld [vmem:[%s5301_s1 + $0x184] ss:$8 sps:$4 sm:$0xff]  }
 0x15e   : > { %v1928_v11 = vpop.permute.xlu1 %1927  ;;  %v1926_v2 = vpop.permute.xlu0 %1925  ;;  %1118 = vmatprep.subr.bf16.mxu1 %v3626_v25  ;;  %v3653_v7 = vld [vmem:[%s3895_s27 + $0xac] ss:$12 sps:$4 sm:$0xff]  }
 0x15f   : > { %v1993_v46 = vsel %vm1983_vm3, %v1926_v2, %v1928_v11  ;;  %2286 = vrot.lane.b32.xlu1 %v4050_v34, %s3840_s24  ;;  %852 = vmatmul.mubr.bf16.gmra.mrb[4].mxu1 %v3638_v32  ;;  %v3651_v32 = vld [vmem:[%s3895_s27 + $0xa8] ss:$12 sps:$4 sm:$0xff]   ;;  %v3659_v11 = vld [vmem:[%s3895_s27 + $0xc4] ss:$12 sps:$4 sm:$0xff]  }
 0x160   : > { %2066 = vmatprep.subr.bf16.mxu0 %v1993_v46  ;;  %1119 = vmatpush1.bf16.msra.mxu1 %v3624_v26  ;;  %v3657_v46 = vld [vmem:[%s3895_s27 + $0xc0] ss:$12 sps:$4 sm:$0xff]  }
 0x161   : > { %1302 = vrot.lane.b32.xlu0 %v4553_v28, %s3841_s25  ;;  %1120 = vmatprep.subr.bf16.mxu1 %v3629_v42 }
 0x162   : > { %v1932_v3 = vpop.permute.xlu1 %1931  ;;  %v1924_v19 = vpop.permute.xlu0 %1923  ;;  %3163 = vmatprep.mubr.msk.bf16.mxu1 %vm790_vm2, %v3648_v15  ;;  %1822 = vmatmul.mubr.bf16.gmra.mrb[20].mxu0 %v3656_v27  ;;  %v4618_v27 = vld [vmem:[%s3895_s27 + $0x94] ss:$12 sps:$4 sm:$0xff]  }
 0x163   : > { %v1992_v34 = vsel %vm1983_vm3, %v1924_v19, %v1926_v2  ;;  %1298 = vrot.lane.b32.xlu1 %v4561_v49, %s3841_s25  ;;  %3285 = vmatprep.mubr.msk.bf16.mxu0 %vm790_vm2, %v3668_v33  ;;  %v3665_v33 = vld [vmem:[%s3895_s27 + $0xdc] ss:$12 sps:$4 sm:$0xff]  }
 0x164   : > { %2067 = vmatpush1.bf16.msra.mxu0 %v1992_v34  ;;  %1121 = vmatpush1.bf16.msra.mxu1 %v3627_v43  ;;  %v3663_v34 = vld [vmem:[%s3895_s27 + $0xd8] ss:$12 sps:$4 sm:$0xff]  }
 0x165   : > { %2288 = vrot.lane.b32.xlu0 %v4057_v35, %s3840_s24  ;;  %1122 = vmatprep.subr.bf16.mxu1 %v3635_v52  ;;  %v3639_v35 = vld [vmem:[%s3895_s27 + $0x78] ss:$12 sps:$4 sm:$0xff]  }
 0x166   : > { %v1930_v21 = vpop.permute.xlu1 %1929  ;;  %v1934_v12 = vpop.permute.xlu0 %1933 }
 0x167   : > { %v1994_v58 = vsel %vm1983_vm3, %v1930_v21, %v1932_v3  ;;  %v1995_v55 = vsel %vm1983_vm3, %v1932_v3, %v1934_v12  ;;  %1306 = vrot.lane.b32.xlu1 %v4579_v16, %s3841_s25  ;;  %862 = vmatmul.mubr.bf16.gmra.mrb[8].mxu1 %v3650_v29  ;;  %v3681_v3 = vld [vmem:[%s5301_s1 + $0x114] ss:$8 sps:$4 sm:$0xff]  }
 0x168   : > { %2068 = vmatprep.subr.bf16.mxu0 %v1995_v55  ;;  %1123 = vmatpush1.bf16.msra.mxu1 %v3633_v20  ;;  %v3671_v29 = vld [vmem:[%s3895_s27 + $0xf4] ss:$12 sps:$4 sm:$0xff]   ;;  %v4645_v12 = vld [vmem:[%s3895_s27 + $0x90] ss:$12 sps:$4 sm:$0xff]  }
 0x169   : > { %2069 = vmatpush1.bf16.msra.mxu0 %v1994_v58  ;;  %2284 = vrot.lane.b32.xlu0 %v4064_v36, %s3840_s24  ;;  %v3645_v36 = vld [vmem:[%s3895_s27 + $0x90] ss:$12 sps:$4 sm:$0xff]  }
 0x16a   : > { %v1940_v31 = vpop.permute.xlu1 %1939  ;;  %v1938_v0 = vpop.permute.xlu0 %1937  ;;  %1124 = vmatprep.subr.bf16.mxu1 %v3641_v13  ;;  %3164 = vmatprep.mubr.msk.bf16.mxu1 %vm790_vm2, %v3660_v22  ;;  %v3683_v13 = vld [vmem:[%s5301_s1 + $0x110] ss:$8 sps:$4 sm:$0xff]  }
 0x16b   : > { %v1997_v1 = vsel %vm1983_vm3, %v1938_v0, %v1940_v31  ;;  %2292 = vrot.lane.b32.xlu1 %v4071_v37, %s3840_s24  ;;  %v3672_v37 = vld [vmem:[%s5301_s1 + $0x104] ss:$8 sps:$4 sm:$0xff]   ;;  %v3669_v22 = vld [vmem:[%s3895_s27 + $0xf0] ss:$12 sps:$4 sm:$0xff]  }
 0x16c   : > { %2070 = vmatprep.subr.bf16.mxu0 %v1997_v1  ;;  %1125 = vmatpush1.bf16.msra.mxu1 %v3639_v35  ;;  %v3677_v35 = vld [vmem:[%s3895_s27 + $0x10c] ss:$12 sps:$4 sm:$0xff]  }
 0x16d   : > { %1308 = vrot.lane.b32.xlu0 %v4596_v10, %s3841_s25  ;;  %1126 = vmatprep.subr.bf16.mxu1 %v3647_v23  ;;  %v3689_v23 = vld [vmem:[%s5301_s1 + $0x4] ss:$8 sps:$4 sm:$0xff]  }
 0x16e   : > { %v1944_v5 = vpop.permute.xlu1 %1943  ;;  %v1936_v25 = vpop.permute.xlu0 %1935  ;;  %v4662_v1 = vld [vmem:[%s3895_s27 + $0xac] ss:$12 sps:$4 sm:$0xff]  }
 0x16f   : > { %v1996_v4 = vsel %vm1983_vm3, %v1936_v25, %v1938_v0  ;;  %1304 = vrot.lane.b32.xlu1 %v4606_v18, %s3841_s25  ;;  %872 = vmatmul.mubr.bf16.gmra.mrb[12].mxu1 %v3662_v24  ;;  %v4668_v24 = vld [vmem:[%s3895_s27 + $0xd8] ss:$12 sps:$4 sm:$0xff]  }
 0x170   : > { %2071 = vmatpush1.bf16.msra.mxu0 %v1996_v4  ;;  %1127 = vmatpush1.bf16.msra.mxu1 %v3645_v36  ;;  %v3680_v36 = vld [vmem:[%s3895_s27 + $0x124] ss:$12 sps:$4 sm:$0xff]   ;;  %v3678_v4 = vld [vmem:[%s3895_s27 + $0x120] ss:$12 sps:$4 sm:$0xff]  }
 0x171   : > { %2294 = vrot.lane.b32.xlu0 %v4078_v38, %s3840_s24  ;;  %1128 = vmatprep.subr.bf16.mxu1 %v3653_v7  ;;  %v3674_v38 = vld [vmem:[%s5301_s1 + $0x100] ss:$8 sps:$4 sm:$0xff]  }
 0x172   : > { %v1942_v26 = vpop.permute.xlu1 %1941  ;;  %v1946_v42 = vpop.permute.xlu0 %1945  ;;  %3165 = vmatprep.mubr.msk.bf16.mxu1 %vm790_vm2, %v3672_v37  ;;  %v4676_v37 = vld [vmem:[%s3895_s27 + $0xf4] ss:$12 sps:$4 sm:$0xff]  }
 0x173   : > { %v1998_v2 = vsel %vm1983_vm3, %v1942_v26, %v1944_v5  ;;  %v1999_v15 = vsel %vm1983_vm3, %v1944_v5, %v1946_v42  ;;  %1312 = vrot.lane.b32.xlu1 %v4618_v27, %s3841_s25  ;;  %v3686_v26 = vld [vmem:[%s3895_s27 + $0x13c] ss:$12 sps:$4 sm:$0xff]  }
 0x174   : > { %2072 = vmatprep.subr.bf16.mxu0 %v1999_v15  ;;  %1129 = vmatpush1.bf16.msra.mxu1 %v3651_v32  ;;  %v4682_v32 = vld [vmem:[%s3895_s27 + $0xb0] ss:$12 sps:$4 sm:$0xff]   ;;  %v4689_v15 = vld [vmem:[%s3895_s27 + $0xa8] ss:$12 sps:$4 sm:$0xff]  }
 0x175   : > { %2073 = vmatpush1.bf16.msra.mxu0 %v1998_v2  ;;  %2290 = vrot.lane.b32.xlu0 %v4085_v39, %s3840_s24  ;;  %v4637_v39 = vld [vmem:[%s3895_s27 + $0x98] ss:$12 sps:$4 sm:$0xff]  }
 0x176   : > { %v1952_v43 = vpop.permute.xlu1 %1951  ;;  %v1950_v52 = vpop.permute.xlu0 %1949  ;;  %1130 = vmatprep.subr.bf16.mxu1 %v3659_v11 }
 0x177   : > { %v2001_v19 = vsel %vm1983_vm3, %v1950_v52, %v1952_v43  ;;  %2298 = vrot.lane.b32.xlu1 %v4092_v40, %s3840_s24  ;;  %882 = vmatmul.mubr.bf16.gmra.mrb[16].mxu1 %v3674_v38  ;;  %v3684_v38 = vld [vmem:[%s3895_s27 + $0x138] ss:$12 sps:$4 sm:$0xff]  }
 0x178   : > { %2074 = vmatprep.subr.bf16.mxu0 %v2001_v19  ;;  %1131 = vmatpush1.bf16.msra.mxu1 %v3657_v46  ;;  %v4695_v46 = vld [vmem:[%s3895_s27 + $0xf8] ss:$12 sps:$4 sm:$0xff]  }
 0x179   : > { %1314 = vrot.lane.b32.xlu0 %v4637_v39, %s3841_s25  ;;  %1132 = vmatprep.subr.bf16.mxu1 %v3665_v33  ;;  %v4702_v19 = vld [vmem:[%s3895_s27 + $0xc4] ss:$12 sps:$4 sm:$0xff]  }
 0x17a   : > { %v1956_v20 = vpop.permute.xlu1 %1955  ;;  %v1948_v21 = vpop.permute.xlu0 %1947  ;;  %3166 = vmatprep.mubr.msk.bf16.mxu1 %vm790_vm2, %v3681_v3 }
 0x17b   : > { %v2000_v40 = vsel %vm1983_vm3, %v1948_v21, %v1950_v52  ;;  %1310 = vrot.lane.b32.xlu1 %v4645_v12, %s3841_s25 }
 0x17c   : > { %2075 = vmatpush1.bf16.msra.mxu0 %v2000_v40  ;;  %1133 = vmatpush1.bf16.msra.mxu1 %v3663_v34  ;;  %v3687_v34 = vld [vmem:[%s5301_s1] ss:$8 sps:$4 sm:$0xff]  }
 0x17d   : > { %2300 = vrot.lane.b32.xlu0 %v4099_v41, %s3840_s24  ;;  %1134 = vmatprep.subr.bf16.mxu1 %v3671_v29  ;;  %v3675_v41 = vld [vmem:[%s3895_s27 + $0x108] ss:$12 sps:$4 sm:$0xff]   ;;  %v4710_v29 = vld [vmem:[%s3895_s27 + $0xf0] ss:$12 sps:$4 sm:$0xff]  }
 0x17e   : > { %v1954_v58 = vpop.permute.xlu1 %1953  ;;  %v1958_v55 = vpop.permute.xlu0 %1957 }
 0x17f   : > { %v2002_v31 = vsel %vm1983_vm3, %v1954_v58, %v1956_v20  ;;  %v2003_v0 = vsel %vm1983_vm3, %v1956_v20, %v1958_v55  ;;  %1318 = vrot.lane.b32.xlu1 %v4662_v1, %s3841_s25  ;;  %892 = vmatmul.mubr.bf16.gmra.mrb[20].mxu1 %v3683_v13  ;;  %v4716_v13 = vld [vmem:[%s3895_s27 + $0x10c] ss:$12 sps:$4 sm:$0xff]  }
 0x180   : > { %2076 = vmatprep.subr.bf16.mxu0 %v2003_v0  ;;  %1135 = vmatpush1.bf16.msra.mxu1 %v3669_v22  ;;  %v4721_v22 = vld [vmem:[%s3895_s27 + $0xc8] ss:$12 sps:$4 sm:$0xff]  }
 0x181   : > { %2077 = vmatpush1.bf16.msra.mxu0 %v2002_v31  ;;  %2296 = vrot.lane.b32.xlu0 %v4668_v24, %s3840_s24  ;;  %v4732_v31 = vld [vmem:[%s3895_s27 + $0x110] ss:$12 sps:$4 sm:$0xff]  }
 0x182   : > { %v1964_v7 = vpop.permute.xlu1 %1963  ;;  %v1962_v5 = vpop.permute.xlu0 %1961  ;;  %1136 = vmatprep.subr.bf16.mxu1 %v3677_v35  ;;  %3207 = vmatprep.mubr.msk.bf16.mxu1 %vm790_vm2, %v3689_v23  ;;  %v4727_v23 = vld [vmem:[%s3895_s27 + $0xc0] ss:$12 sps:$4 sm:$0xff]  }
 0x183   : > { %v2005_v25 = vsel %vm1983_vm3, %v1962_v5, %v1964_v7  ;;  %2304 = vrot.lane.b32.xlu1 %v4676_v37, %s3840_s24 }
 0x184   : > { %2078 = vmatprep.subr.bf16.mxu0 %v2005_v25  ;;  %1137 = vmatpush1.bf16.msra.mxu1 %v3675_v41  ;;  %v3666_v25 = vld [vmem:[%s5301_s1 + $0x180] ss:$8 sps:$4 sm:$0xff]  }
 0x185   : > { %1320 = vrot.lane.b32.xlu0 %v4682_v32, %s3841_s25  ;;  %1138 = vmatprep.subr.bf16.mxu1 %v3680_v36 }
 0x186   : > { %v1968_v42 = vpop.permute.xlu1 %1967  ;;  %v1960_v11 = vpop.permute.xlu0 %1959 }
 0x187   : > { %v2004_v2 = vsel %vm1983_vm3, %v1960_v11, %v1962_v5  ;;  %1316 = vrot.lane.b32.xlu1 %v4689_v15, %s3841_s25  ;;  %v4739_v5 = vld [vmem:[%s3895_s27 + $0xdc] ss:$12 sps:$4 sm:$0xff]  }
 0x188   : > { %2079 = vmatpush1.bf16.msra.mxu0 %v2004_v2  ;;  %1139 = vmatpush1.bf16.msra.mxu1 %v3678_v4  ;;  %v4747_v4 = vld [vmem:[%s3895_s27 + $0x108] ss:$12 sps:$4 sm:$0xff]  }
 0x189   : > { %2306 = vrot.lane.b32.xlu0 %v4695_v46, %s3840_s24  ;;  %1140 = vmatprep.subr.bf16.mxu1 %v3686_v26  ;;  %v3690_v26 = vld [vmem:[%s5301_s1 + $0x194] ss:$8 sps:$4 sm:$0xff]  }
 0x18a   : > { %v1966_v33 = vpop.permute.xlu1 %1965  ;;  %v1970_v43 = vpop.permute.xlu0 %1969 }
 0x18b   : > { %v2006_v52 = vsel %vm1983_vm3, %v1966_v33, %v1968_v42  ;;  %v2007_v3 = vsel %vm1983_vm3, %v1968_v42, %v1970_v43  ;;  %1324 = vrot.lane.b32.xlu1 %v4702_v19, %s3841_s25  ;;  %v4761_v33 = vld [vmem:[%s3895_s27 + $0xe0] ss:$12 sps:$4 sm:$0xff]  }
 0x18c   : > { %2080 = vmatprep.subr.bf16.mxu0 %v2007_v3  ;;  %1141 = vmatpush1.bf16.msra.mxu1 %v3684_v38  ;;  %v4756_v38 = vld [vmem:[%s3895_s27 + $0x124] ss:$12 sps:$4 sm:$0xff]  }
 0x18d   : > { %2081 = vmatpush1.bf16.msra.mxu0 %v2006_v52  ;;  %2302 = vrot.lane.b32.xlu0 %v4710_v29, %s3840_s24 }
 0x18e   : > { %v1976_v20 = vpop.permute.xlu1 %1975  ;;  %v1974_v21 = vpop.permute.xlu0 %1973 }
 0x18f   : > { %v2009_v40 = vsel %vm1983_vm3, %v1974_v21, %v1976_v20  ;;  %2310 = vrot.lane.b32.xlu1 %v4716_v13, %s3840_s24  ;;  %1147 = vmatmul.mubr.bf16.vlgmr.msra.gmra.mrb[0].mxu1 %v3687_v34  ;;  %v3692_v34 = vld [vmem:[%s5301_s1 + $0x190] ss:$8 sps:$4 sm:$0xff]   ;;  %v4773_v20 = vld [vmem:[%s3895_s27 + $0x128] ss:$12 sps:$4 sm:$0xff]  }
 0x190   : > { %2082 = vmatprep.subr.bf16.mxu0 %v2009_v40 }
 0x191   : > { %1326 = vrot.lane.b32.xlu0 %v4721_v22, %s3841_s25 }
 0x192   : > { %v1980_v58 = vpop.permute.xlu1 %1979  ;;  %v1972_v55 = vpop.permute.xlu0 %1971 }
 0x193   : > { %v2008_v35 = vsel %vm1983_vm3, %v1972_v55, %v1974_v21  ;;  %1322 = vrot.lane.b32.xlu1 %v4727_v23, %s3841_s25 }
 0x194   : > { %2083 = vmatpush1.bf16.msra.mxu0 %v2008_v35 }
 0x195   : > { %2312 = vrot.lane.b32.xlu0 %v4732_v31, %s3840_s24 }
 0x196   : > { %v1978_v0 = vpop.permute.xlu1 %1977  ;;  %v1982_v41 = vpop.permute.xlu0 %1981 }
 0x197   : > { %v2010_v36 = vsel %vm1983_vm3, %v1978_v0, %v1980_v58  ;;  %v2011_v7 = vsel %vm1983_vm3, %v1980_v58, %v1982_v41  ;;  %1330 = vrot.lane.b32.xlu1 %v4739_v5, %s3841_s25  ;;  %v3693_v58 = vld [vmem:[%s5301_s1 + $0x1a4] ss:$8 sps:$4 sm:$0xff]  }
 0x198   : > { %2084 = vmatprep.subr.bf16.mxu0 %v2011_v7  ;;  %v4785_v0 = vld [vmem:[%s3895_s27 + $0x120] ss:$12 sps:$4 sm:$0xff]  }
 0x199   : > { %2085 = vmatpush1.bf16.msra.mxu0 %v2010_v36  ;;  %2308 = vrot.lane.b32.xlu0 %v4747_v4, %s3840_s24 }
 0x19a   : > { %v2247_v42 = vpop.permute.xlu1 %2246  ;;  %v2245_v11 = vpop.permute.xlu0 %2244 }
 0x19b   : > { %v2328_v2 = vsel %vm2326_vm4, %v2245_v11, %v2247_v42  ;;  %2316 = vrot.lane.b32.xlu1 %v4756_v38, %s3840_s24  ;;  %v3695_v42 = vld [vmem:[%s5301_s1 + $0x1a0] ss:$8 sps:$4 sm:$0xff]  }
 0x19c   : > { %2401 = vmatprep.subr.bf16.mxu0 %v2328_v2  ;;  %2091 = vmatmul.mubr.bf16.vlgmr.msra.gmra.mrb[0].mxu0 %v3666_v25  ;;  %v4792_v25 = vld [vmem:[%s3895_s27 + $0x13c] ss:$12 sps:$4 sm:$0xff]  }
 0x19d   : > { %1332 = vrot.lane.b32.xlu0 %v4761_v33, %s3841_s25  ;;  %3286 = vmatprep.mubr.msk.bf16.mxu0 %vm790_vm2, %v3690_v26  ;;  %v3704_v26 = vld [vmem:[%s5301_s1 + $0x14] ss:$8 sps:$4 sm:$0xff]  }
 0x19e   : > { %v2251_v43 = vpop.permute.xlu1 %2250  ;;  %v2243_v52 = vpop.permute.xlu0 %2242  ;;  %3208 = vmatprep.mubr.msk.bf16.mxu1 %vm790_vm2, %v3704_v26 }
 0x19f   : > { %v2327_v3 = vsel %vm2326_vm4, %v2243_v52, %v2245_v11  ;;  %1328 = vrot.lane.b32.xlu1 %v4668_v24, %s3841_s25  ;;  %v3706_v11 = vld [vmem:[%s5301_s1 + $0x10] ss:$8 sps:$4 sm:$0xff]   ;;  %v3696_v52 = vld [vmem:[%s5301_s1 + $0x1b4] ss:$8 sps:$4 sm:$0xff]  }
 0x1a0   : > { %2402 = vmatpush1.bf16.msra.mxu0 %v2327_v3  ;;  %1157 = vmatmul.mubr.bf16.gmra.mrb[4].mxu1 %v3706_v11 }
 0x1a1   : > { %2318 = vrot.lane.b32.xlu0 %v4773_v20, %s3840_s24 }
 0x1a2   : > { %v2249_v21 = vpop.permute.xlu1 %2248  ;;  %v2253_v40 = vpop.permute.xlu0 %2252 }
 0x1a3   : > { %v2329_v55 = vsel %vm2326_vm4, %v2249_v21, %v2251_v43  ;;  %v2330_v35 = vsel %vm2326_vm4, %v2251_v43, %v2253_v40  ;;  %1336 = vrot.lane.b32.xlu1 %v4676_v37, %s3841_s25 }
 0x1a4   : > { %2403 = vmatprep.subr.bf16.mxu0 %v2330_v35  ;;  %2101 = vmatmul.mubr.bf16.gmra.mrb[4].mxu0 %v3692_v34  ;;  %v4815_v34 = vld [vmem:[%s3895_s27 + $0x140] ss:$12 sps:$4 sm:$0xff]   ;;  %v4827_v35 = vld [vmem:[%s3895_s27 + $0x138] ss:$12 sps:$4 sm:$0xff]  }
 0x1a5   : > { %2404 = vmatpush1.bf16.msra.mxu0 %v2329_v55  ;;  %2314 = vrot.lane.b32.xlu0 %v4785_v0, %s3840_s24  ;;  %v3711_v55 = vld [vmem:[%s5301_s1 + $0x24] ss:$8 sps:$4 sm:$0xff]  }
 0x1a6   : > { %v2259_v41 = vpop.permute.xlu1 %2258  ;;  %v2257_v36 = vpop.permute.xlu0 %2256  ;;  %3287 = vmatprep.mubr.msk.bf16.mxu0 %vm790_vm2, %v3693_v58  ;;  %3209 = vmatprep.mubr.msk.bf16.mxu1 %vm790_vm2, %v3711_v55  ;;  %v3813_v55 = vld [vmem:[%s3895_s27 + $0x8] ss:$12 sps:$4 sm:$0xff]  }
 0x1a7   : > { %v2332_v7 = vsel %vm2326_vm4, %v2257_v36, %v2259_v41  ;;  %2322 = vrot.lane.b32.xlu1 %v4792_v25, %s3840_s24  ;;  %v3698_v41 = vld [vmem:[%s5301_s1 + $0x1b0] ss:$8 sps:$4 sm:$0xff]  }
 0x1a8   : > { %2405 = vmatprep.subr.bf16.mxu0 %v2332_v7 }
 0x1a9   : > { %1338 = vrot.lane.b32.xlu0 %v4695_v46, %s3841_s25 }
 0x1aa   : > { %v1277_v2 = vpop.permute.xlu1 %1276  ;;  %v2255_v43 = vpop.permute.xlu0 %2254 }
 0x1ab   : > { %v2331_v3 = vsel %vm2326_vm4, %v2255_v43, %v2257_v36  ;;  %1334 = vrot.lane.b32.xlu1 %v4710_v29, %s3841_s25  ;;  %v3713_v36 = vld [vmem:[%s5301_s1 + $0x20] ss:$8 sps:$4 sm:$0xff]  }
 0x1ac   : > { %2406 = vmatpush1.bf16.msra.mxu0 %v2331_v3  ;;  %1167 = vmatmul.mubr.bf16.gmra.mrb[8].mxu1 %v3713_v36 }
 0x1ad   : > { %2324 = vrot.lane.b32.xlu0 %v4815_v34, %s3840_s24  ;;  %2111 = vmatmul.mubr.bf16.gmra.mrb[8].mxu0 %v3695_v42  ;;  %v3699_v42 = vld [vmem:[%s5301_s1 + $0x1c4] ss:$8 sps:$4 sm:$0xff]  }
 0x1ae   : > { %v2263_v21 = vpop.permute.xlu1 %2262  ;;  %v1279_v40 = vpop.permute.xlu0 %1278  ;;  %3288 = vmatprep.mubr.msk.bf16.mxu0 %vm790_vm2, %v3696_v52  ;;  %v3812_v52 = vld [vmem:[%s3895_s27 + $0x4] ss:$12 sps:$4 sm:$0xff]  }
 0x1af   : > { %v1360_v58 = vsel %vm1358_vm5, %v1277_v2, %v1279_v40  ;;  %1342 = vrot.lane.b32.xlu1 %v4716_v13, %s3841_s25 }
 0x1b0   : > { %1433 = vmatprep.subr.bf16.mxu1 %v1360_v58  ;;  %v3716_v58 = vld [vmem:[%s5301_s1 + $0x34] ss:$8 sps:$4 sm:$0xff]  }
 0x1b1   : > { %2320 = vrot.lane.b32.xlu0 %v4827_v35, %s3840_s24  ;;  %s3842_s24 = smov 14   ;;  %3210 = vmatprep.mubr.msk.bf16.mxu1 %vm790_vm2, %v3716_v58  ;;  %v3722_v58 = vld [vmem:[%s5301_s1 + $0x44] ss:$8 sps:$4 sm:$0xff]  }
 0x1b2   : > { %v1275_v7 = vpop.permute.xlu1 %1274  ;;  %v2265_v26 = vpop.permute.xlu0 %2264 }
 0x1b3   : > { %v1359_v11 = vsel %vm1358_vm5, %v1275_v7, %v1277_v2  ;;  %v2334_v43 = vsel %vm2326_vm4, %v2263_v21, %v2265_v26  ;;  %2587 = vrot.lane.b32.xlu1 %v3812_v52, %s3842_s24  ;;  %v3702_v26 = vld [vmem:[%s5301_s1 + $0x1d4] ss:$8 sps:$4 sm:$0xff]  }
 0x1b4   : > { %1434 = vmatpush1.bf16.msra.mxu1 %v1359_v11  ;;  %2407 = vmatprep.subr.bf16.mxu0 %v2334_v43  ;;  %v3814_v11 = vld [vmem:[%s3895_s27] ss:$12 sps:$4 sm:$0xff]  }
 0x1b5   : > { %1344 = vrot.lane.b32.xlu0 %v4732_v31, %s3841_s25  ;;  %2121 = vmatmul.mubr.bf16.gmra.mrb[12].mxu0 %v3698_v41  ;;  %v3701_v41 = vld [vmem:[%s5301_s1 + $0x1c0] ss:$8 sps:$4 sm:$0xff]  }
 0x1b6   : > { %v1283_v3 = vpop.permute.xlu1 %1282  ;;  %v2261_v40 = vpop.permute.xlu0 %2260  ;;  %3289 = vmatprep.mubr.msk.bf16.mxu0 %vm790_vm2, %v3699_v42 }
 0x1b7   : > { %v2333_v2 = vsel %vm2326_vm4, %v2261_v40, %v2263_v21  ;;  %1340 = vrot.lane.b32.xlu1 %v4747_v4, %s3841_s25  ;;  %v3718_v21 = vld [vmem:[%s5301_s1 + $0x30] ss:$8 sps:$4 sm:$0xff]  }
 0x1b8   : > { %2408 = vmatpush1.bf16.msra.mxu0 %v2333_v2  ;;  %1177 = vmatmul.mubr.bf16.gmra.mrb[12].mxu1 %v3718_v21 }
 0x1b9   : > { %2589 = vrot.lane.b32.xlu0 %v3813_v55, %s3842_s24  ;;  %v3707_v55 = vld [vmem:[%s5301_s1 + $0x1d0] ss:$8 sps:$4 sm:$0xff]   ;;  %3211 = vmatprep.mubr.msk.bf16.mxu1 %vm790_vm2, %v3722_v58 }
 0x1ba   : > { %v2269_v36 = vpop.permute.xlu1 %2268  ;;  %v1285_v7 = vpop.permute.xlu0 %1284 }
 0x1bb   : > { %v1362_v42 = vsel %vm1358_vm5, %v1283_v3, %v1285_v7  ;;  %1348 = vrot.lane.b32.xlu1 %v4756_v38, %s3841_s25 }
 0x1bc   : > { %1435 = vmatprep.subr.bf16.mxu1 %v1362_v42 }
 0x1bd   : > { %2585 = vrot.lane.b32.xlu0 %v3814_v11, %s3842_s24  ;;  %2131 = vmatmul.mubr.bf16.gmra.mrb[16].mxu0 %v3701_v41 }
 0x1be   : > { %v1281_v43 = vpop.permute.xlu1 %1280  ;;  %v2271_v52 = vpop.permute.xlu0 %2270  ;;  %3290 = vmatprep.mubr.msk.bf16.mxu0 %vm790_vm2, %v3702_v26  ;;  %v3815_v26 = vld [vmem:[%s3895_s27 + $0x20] ss:$12 sps:$4 sm:$0xff]  }
 0x1bf   : > { %v1361_v40 = vsel %vm1358_vm5, %v1281_v43, %v1283_v3  ;;  %v2336_v2 = vsel %vm2326_vm4, %v2269_v36, %v2271_v52  ;;  %2593 = vrot.lane.b32.xlu1 %v4414_v8, %s3842_s24  ;;  %v3724_v3 = vld [vmem:[%s5301_s1 + $0x40] ss:$8 sps:$4 sm:$0xff]   ;;  %v3710_v8 = vld [vmem:[%s5301_s1 + $0x1e4] ss:$8 sps:$4 sm:$0xff]   ;;  %v3730_v52 = vld [vmem:[%s5301_s1 + $0x50] ss:$8 sps:$4 sm:$0xff]  }
 0x1c0   : > { %1436 = vmatpush1.bf16.msra.mxu1 %v1361_v40  ;;  %2409 = vmatprep.subr.bf16.mxu0 %v2336_v2 }
 0x1c1   : > { %1350 = vrot.lane.b32.xlu0 %v4773_v20, %s3841_s25  ;;  %1187 = vmatmul.mubr.bf16.gmra.mrb[16].mxu1 %v3724_v3 }
 0x1c2   : > { %v1289_v41 = vpop.permute.xlu1 %1288  ;;  %v2267_v21 = vpop.permute.xlu0 %2266 }
 0x1c3   : > { %v2335_v7 = vsel %vm2326_vm4, %v2267_v21, %v2269_v36  ;;  %1346 = vrot.lane.b32.xlu1 %v4785_v0, %s3841_s25  ;;  %v3728_v36 = vld [vmem:[%s5301_s1 + $0x54] ss:$8 sps:$4 sm:$0xff]  }
 0x1c4   : > { %2410 = vmatpush1.bf16.msra.mxu0 %v2335_v7  ;;  %3212 = vmatprep.mubr.msk.bf16.mxu1 %vm790_vm2, %v3728_v36 }
 0x1c5   : > { %2595 = vrot.lane.b32.xlu0 %v3815_v26, %s3842_s24  ;;  %2141 = vmatmul.mubr.bf16.gmra.mrb[20].mxu0 %v3707_v55 }
 0x1c6   : > { %v2275_v42 = vpop.permute.xlu1 %2274  ;;  %v1291_v11 = vpop.permute.xlu0 %1290  ;;  %3315 = vmatprep.mubr.msk.bf16.mxu0 %vm790_vm2, %v3710_v8 }
 0x1c7   : > { %v1364_v43 = vsel %vm1358_vm5, %v1289_v41, %v1291_v11  ;;  %1354 = vrot.lane.b32.xlu1 %v4792_v25, %s3841_s25 }
 0x1c8   : > { %1437 = vmatprep.subr.bf16.mxu1 %v1364_v43 }
 0x1c9   : > { %2591 = vrot.lane.b32.xlu0 %v4435_v6, %s3842_s24  ;;  %1197 = vmatmul.mubr.bf16.gmra.mrb[20].mxu1 %v3730_v52 }
 0x1ca   : > { %v1287_v40 = vpop.permute.xlu1 %1286  ;;  %v2277_v2 = vpop.permute.xlu0 %2276 }
 0x1cb   : > { %v1363_v58 = vsel %vm1358_vm5, %v1287_v40, %v1289_v41  ;;  %v2338_v55 = vsel %vm2326_vm4, %v2275_v42, %v2277_v2  ;;  %2599 = vrot.lane.b32.xlu1 %v4444_v63, %s3842_s24  ;;  %v3736_v41 = vld [vmem:[%s5301_s1 + $0x124] ss:$8 sps:$4 sm:$0xff]  }
 0x1cc   : > { %1438 = vmatpush1.bf16.msra.mxu1 %v1363_v58  ;;  %2411 = vmatprep.subr.bf16.mxu0 %v2338_v55 }
 0x1cd   : > { %1356 = vrot.lane.b32.xlu0 %v4815_v34, %s3841_s25  ;;  %3237 = vmatprep.mubr.msk.bf16.mxu1 %vm790_vm2, %v3736_v41 }
 0x1ce   : > { %v1295_v6 = vpop.permute.xlu1 %1294  ;;  %v2273_v3 = vpop.permute.xlu0 %2272 }
 0x1cf   : > { %v2337_v21 = vsel %vm2326_vm4, %v2273_v3, %v2275_v42  ;;  %1352 = vrot.lane.b32.xlu1 %v4827_v35, %s3841_s25 }
 0x1d0   : > { %2412 = vmatpush1.bf16.msra.mxu0 %v2337_v21 }
 0x1d1   : > { %2601 = vrot.lane.b32.xlu0 %v4461_v62, %s3842_s24 }
 0x1d2   : > { %v2281_v63 = vpop.permute.xlu1 %2280  ;;  %v1297_v8 = vpop.permute.xlu0 %1296 }
 0x1d3   : > { %v1366_v7 = vsel %vm1358_vm5, %v1295_v6, %v1297_v8  ;;  %2605 = vrot.lane.b32.xlu1 %v4482_v14, %s3842_s24 }
 0x1d4   : > { %1439 = vmatprep.subr.bf16.mxu1 %v1366_v7 }
 0x1d5   : > { %2597 = vrot.lane.b32.xlu0 %v4468_v17, %s3842_s24 }
 0x1d6   : > { %v1293_v26 = vpop.permute.xlu1 %1292  ;;  %v2283_v42 = vpop.permute.xlu0 %2282 }
 0x1d7   : > { %v1365_v11 = vsel %vm1358_vm5, %v1293_v26, %v1295_v6  ;;  %v2340_v43 = vsel %vm2326_vm4, %v2281_v63, %v2283_v42  ;;  %2603 = vrot.lane.b32.xlu1 %v4512_v61, %s3842_s24 }
 0x1d8   : > { %1440 = vmatpush1.bf16.msra.mxu1 %v1365_v11  ;;  %2413 = vmatprep.subr.bf16.mxu0 %v2340_v43 }
 0x1d9   : > { %2607 = vrot.lane.b32.xlu0 %v4499_v30, %s3842_s24 }
 0x1da   : > { %v1301_v62 = vpop.permute.xlu1 %1300  ;;  %v2279_v14 = vpop.permute.xlu0 %2278 }
 0x1db   : > { %v2339_v36 = vsel %vm2326_vm4, %v2279_v14, %v2281_v63  ;;  %2613 = vrot.lane.b32.xlu1 %v4553_v28, %s3842_s24 }
 0x1dc   : > { %2414 = vmatpush1.bf16.msra.mxu0 %v2339_v36 }
 0x1dd   : > { %2611 = vrot.lane.b32.xlu0 %v4527_v9, %s3842_s24 }
 0x1de   : > { %v2287_v17 = vpop.permute.xlu1 %2286  ;;  %v1303_v52 = vpop.permute.xlu0 %1302 }
 0x1df   : > { %v1368_v61 = vsel %vm1358_vm5, %v1301_v62, %v1303_v52  ;;  %2617 = vrot.lane.b32.xlu1 %v4579_v16, %s3842_s24 }
 0x1e0   : > { %1441 = vmatprep.subr.bf16.mxu1 %v1368_v61 }
 0x1e1   : > { %2609 = vrot.lane.b32.xlu0 %v4561_v49, %s3842_s24 }
 0x1e2   : > { %v1299_v30 = vpop.permute.xlu1 %1298  ;;  %v2289_v40 = vpop.permute.xlu0 %2288 }
 0x1e3   : > { %v1367_v2 = vsel %vm1358_vm5, %v1299_v30, %v1301_v62  ;;  %v2342_v28 = vsel %vm2326_vm4, %v2287_v17, %v2289_v40  ;;  %2615 = vrot.lane.b32.xlu1 %v4606_v18, %s3842_s24 }
 0x1e4   : > { %1442 = vmatpush1.bf16.msra.mxu1 %v1367_v2  ;;  %2415 = vmatprep.subr.bf16.mxu0 %v2342_v28 }
 0x1e5   : > { %2619 = vrot.lane.b32.xlu0 %v4596_v10, %s3842_s24 }
 0x1e6   : > { %v1307_v9 = vpop.permute.xlu1 %1306  ;;  %v2285_v16 = vpop.permute.xlu0 %2284 }
 0x1e7   : > { %v2341_v58 = vsel %vm2326_vm4, %v2285_v16, %v2287_v17  ;;  %2625 = vrot.lane.b32.xlu1 %v4637_v39, %s3842_s24 }
 0x1e8   : > { %2416 = vmatpush1.bf16.msra.mxu0 %v2341_v58 }
 0x1e9   : > { %2623 = vrot.lane.b32.xlu0 %v4618_v27, %s3842_s24 }
 0x1ea   : > { %v2293_v49 = vpop.permute.xlu1 %2292  ;;  %v1309_v55 = vpop.permute.xlu0 %1308 }
 0x1eb   : > { %v1370_v18 = vsel %vm1358_vm5, %v1307_v9, %v1309_v55  ;;  %2629 = vrot.lane.b32.xlu1 %v4662_v1, %s3842_s24  ;;  %v3843_v55 = vmov 1  }
 0x1ec   : > { %1443 = vmatprep.subr.bf16.mxu1 %v1370_v18  ;;  %3547 = vset.pattern.permute.xlu1 %v3843_v55 }
 0x1ed   : > { %2621 = vrot.lane.b32.xlu0 %v4645_v12, %s3842_s24 }
 0x1ee   : > { %v1305_v10 = vpop.permute.xlu1 %1304  ;;  %v2295_v6 = vpop.permute.xlu0 %2294  ;;  %3546 = vset.pattern.permute.xlu0 %v3843_v55 }
 0x1ef   : > { %v1369_v3 = vsel %vm1358_vm5, %v1305_v10, %v1307_v9  ;;  %v2344_v39 = vsel %vm2326_vm4, %v2293_v49, %v2295_v6  ;;  %2627 = vrot.lane.b32.xlu1 %v4689_v15, %s3842_s24  ;;  %v3816_v6 = vld [vmem:[%s5302_s2 + $0x8] sm:$0xff] }
 0x1f0   : > { %1444 = vmatpush1.bf16.msra.mxu1 %v1369_v3  ;;  %2417 = vmatprep.subr.bf16.mxu0 %v2344_v39  ;;  %v3817_v3 = vld [vmem:[%s5302_s2] sm:$0xff] }
 0x1f1   : > { %2631 = vrot.lane.b32.xlu0 %v4682_v32, %s3842_s24 }
 0x1f2   : > { %v1313_v27 = vpop.permute.xlu1 %1312  ;;  %v2291_v1 = vpop.permute.xlu0 %2290 }
 0x1f3   : > { %v2343_v21 = vsel %vm2326_vm4, %v2291_v1, %v2293_v49  ;;  %2637 = vrot.lane.b32.xlu1 %v4721_v22, %s3842_s24 }
 0x1f4   : > { %2418 = vmatpush1.bf16.msra.mxu0 %v2343_v21 }
 0x1f5   : > { %2635 = vrot.lane.b32.xlu0 %v4702_v19, %s3842_s24 }
 0x1f6   : > { %v2299_v12 = vpop.permute.xlu1 %2298  ;;  %v1315_v41 = vpop.permute.xlu0 %1314 }
 0x1f7   : > { %v1372_v15 = vsel %vm1358_vm5, %v1313_v27, %v1315_v41  ;;  %2641 = vrot.lane.b32.xlu1 %v4739_v5, %s3842_s24  ;;  %v3819_v41 = vld [vmem:[%s5302_s2 + $0x18] sm:$0xff] }
 0x1f8   : > { %1445 = vmatprep.subr.bf16.mxu1 %v1372_v15 }
 0x1f9   : > { %2633 = vrot.lane.b32.xlu0 %v4727_v23, %s3842_s24 }
 0x1fa   : > { %v1311_v32 = vpop.permute.xlu1 %1310  ;;  %v2301_v63 = vpop.permute.xlu0 %2300 }
 0x1fb   : > { %v1371_v8 = vsel %vm1358_vm5, %v1311_v32, %v1313_v27  ;;  %v2346_v22 = vsel %vm2326_vm4, %v2299_v12, %v2301_v63  ;;  %2639 = vrot.lane.b32.xlu1 %v4668_v24, %s3842_s24  ;;  %v3708_v32 = vld [vmem:[%s5301_s1 + $0x1e0] ss:$8 sps:$4 sm:$0xff]   ;;  %v3714_v63 = vld [vmem:[%s5301_s1 + $0x1f4] ss:$8 sps:$4 sm:$0xff]  }
 0x1fc   : > { %1446 = vmatpush1.bf16.msra.mxu1 %v1371_v8  ;;  %2419 = vmatprep.subr.bf16.mxu0 %v2346_v22 }
 0x1fd   : > { %2643 = vrot.lane.b32.xlu0 %v4761_v33, %s3842_s24 }
 0x1fe   : > { %v1319_v19 = vpop.permute.xlu1 %1318  ;;  %v2297_v5 = vpop.permute.xlu0 %2296 }
 0x1ff   : > { %v2345_v7 = vsel %vm2326_vm4, %v2297_v5, %v2299_v12  ;;  %2649 = vrot.lane.b32.xlu1 %v4695_v46, %s3842_s24  ;;  %v3818_v12 = vld [vmem:[%s5302_s2 + $0x10] sm:$0xff]  ;;  %v3821_v5 = vld [vmem:[%s5302_s2 + $0x28] sm:$0xff] }
 0x200   : > { %2420 = vmatpush1.bf16.msra.mxu0 %v2345_v7 }
 0x201   : > { %2647 = vrot.lane.b32.xlu0 %v4676_v37, %s3842_s24 }
 0x202   : > { %v2305_v23 = vpop.permute.xlu1 %2304  ;;  %v1321_v26 = vpop.permute.xlu0 %1320 }
 0x203   : > { %v1374_v24 = vsel %vm1358_vm5, %v1319_v19, %v1321_v26  ;;  %2653 = vrot.lane.b32.xlu1 %v4716_v13, %s3842_s24 }
 0x204   : > { %1447 = vmatprep.subr.bf16.mxu1 %v1374_v24  ;;  %v3822_v24 = vld [vmem:[%s5302_s2 + $0x30] sm:$0xff] }
 0x205   : > { %2645 = vrot.lane.b32.xlu0 %v4710_v29, %s3842_s24 }
 0x206   : > { %v1317_v33 = vpop.permute.xlu1 %1316  ;;  %v2307_v42 = vpop.permute.xlu0 %2306 }
 0x207   : > { %v1373_v11 = vsel %vm1358_vm5, %v1317_v33, %v1319_v19  ;;  %v2348_v46 = vsel %vm2326_vm4, %v2305_v23, %v2307_v42  ;;  %2651 = vrot.lane.b32.xlu1 %v4747_v4, %s3842_s24  ;;  %v3820_v19 = vld [vmem:[%s5302_s2 + $0x20] sm:$0xff]  ;;  %v3823_v33 = vld [vmem:[%s5302_s2 + $0x38] sm:$0xff] }
 0x208   : > { %1448 = vmatpush1.bf16.msra.mxu1 %v1373_v11  ;;  %2421 = vmatprep.subr.bf16.mxu0 %v2348_v46  ;;  %v3719_v46 = vld [vmem:[%s5301_s1 + $0x1f0] ss:$8 sps:$4 sm:$0xff]  }
 0x209   : > { %2655 = vrot.lane.b32.xlu0 %v4732_v31, %s3842_s24 }
 0x20a   : > { %v1325_v37 = vpop.permute.xlu1 %1324  ;;  %v2303_v13 = vpop.permute.xlu0 %2302 }
 0x20b   : > { %v2347_v43 = vsel %vm2326_vm4, %v2303_v13, %v2305_v23  ;;  %2661 = vrot.lane.b32.xlu1 %v4773_v20, %s3842_s24 }
 0x20c   : > { %2422 = vmatpush1.bf16.msra.mxu0 %v2347_v43 }
 0x20d   : > { %2659 = vrot.lane.b32.xlu0 %v4756_v38, %s3842_s24 }
 0x20e   : > { %v2311_v29 = vpop.permute.xlu1 %2310  ;;  %v1327_v62 = vpop.permute.xlu0 %1326 }
 0x20f   : > { %v1376_v4 = vsel %vm1358_vm5, %v1325_v37, %v1327_v62  ;;  %2665 = vrot.lane.b32.xlu1 %v4792_v25, %s3842_s24  ;;  %v3825_v62 = vld [vmem:[%s5302_s2 + $0x48] sm:$0xff] }
 0x210   : > { %1449 = vmatprep.subr.bf16.mxu1 %v1376_v4 }
 0x211   : > { %2657 = vrot.lane.b32.xlu0 %v4785_v0, %s3842_s24 }
 0x212   : > { %v1323_v31 = vpop.permute.xlu1 %1322  ;;  %v2313_v14 = vpop.permute.xlu0 %2312 }
 0x213   : > { %v1375_v36 = vsel %vm1358_vm5, %v1323_v31, %v1325_v37  ;;  %v2350_v20 = vsel %vm2326_vm4, %v2311_v29, %v2313_v14  ;;  %2663 = vrot.lane.b32.xlu1 %v4827_v35, %s3842_s24  ;;  %v3720_v37 = vld [vmem:[%s5301_s1 + $0x204] ss:$8 sps:$4 sm:$0xff]  }
 0x214   : > { %1450 = vmatpush1.bf16.msra.mxu1 %v1375_v36  ;;  %2423 = vmatprep.subr.bf16.mxu0 %v2350_v20  ;;  %v3826_v36 = vld [vmem:[%s5302_s2 + $0x50] sm:$0xff]  ;;  %v3827_v20 = vld [vmem:[%s5302_s2 + $0x58] sm:$0xff] }
 0x215   : > { %2667 = vrot.lane.b32.xlu0 %v4815_v34, %s3842_s24 }
 0x216   : > { %v1331_v38 = vpop.permute.xlu1 %1330  ;;  %v2309_v25 = vpop.permute.xlu0 %2308 }
 0x217   : > { %v2349_v17 = vsel %vm2326_vm4, %v2309_v25, %v2311_v29  ;;  %247 = vperm.xlu1 %3547, %v3816_v6   ;;  %v3824_v29 = vld [vmem:[%s5302_s2 + $0x40] sm:$0xff] }
 0x218   : > { %2424 = vmatpush1.bf16.msra.mxu0 %v2349_v17  ;;  %v3725_v25 = vld [vmem:[%s5301_s1 + $0x200] ss:$8 sps:$4 sm:$0xff]   ;;  %v3726_v17 = vld [vmem:[%s5301_s1 + $0x214] ss:$8 sps:$4 sm:$0xff]  }
 0x219   : > { %243 = vperm.xlu0 %3546, %v3817_v3   ;;  %v3734_v6 = vld [vmem:[%s5301_s1 + $0x120] ss:$8 sps:$4 sm:$0xff]  }
 0x21a   : > { %v2317_v0 = vpop.permute.xlu1 %2316  ;;  %v1333_v52 = vpop.permute.xlu0 %1332  ;;  %v3737_v3 = vld [vmem:[%s5301_s1 + $0x220] ss:$8 sps:$4 sm:$0xff]  }
 0x21b   : > { %v1378_v61 = vsel %vm1358_vm5, %v1331_v38, %v1333_v52  ;;  %251 = vperm.xlu1 %3547, %v3818_v12  }
 0x21c   : > { %1451 = vmatprep.subr.bf16.mxu1 %v1378_v61 }
 0x21d   : > { %255 = vperm.xlu0 %3546, %v3819_v41  }
 0x21e   : > { %v1329_v30 = vpop.permute.xlu1 %1328  ;;  %v2319_v40 = vpop.permute.xlu0 %2318 }
 0x21f   : > { %v1377_v2 = vsel %vm1358_vm5, %v1329_v30, %v1331_v38  ;;  %v2352_v35 = vsel %vm2326_vm4, %v2317_v0, %v2319_v40  ;;  %259 = vperm.xlu1 %3547, %v3820_v19   ;;  %v3744_v19 = vld [vmem:[%s5301_s1 + $0x144] ss:$8 sps:$4 sm:$0xff]  }
 0x220   : > { %1452 = vmatpush1.bf16.msra.mxu1 %v1377_v2  ;;  %2425 = vmatprep.subr.bf16.mxu0 %v2352_v35 }
 0x221   : > { %263 = vperm.xlu0 %3546, %v3821_v5  }
 0x222   : > { %v1337_v28 = vpop.permute.xlu1 %1336  ;;  %v2315_v34 = vpop.permute.xlu0 %2314 }
 0x223   : > { %v2351_v9 = vsel %vm2326_vm4, %v2315_v34, %v2317_v0  ;;  %267 = vperm.xlu1 %3547, %v3822_v24   ;;  %v3732_v34 = vld [vmem:[%s5301_s1 + $0x224] ss:$8 sps:$4 sm:$0xff]  }
 0x224   : > { %2426 = vmatpush1.bf16.msra.mxu0 %v2351_v9 }
 0x225   : > { %271 = vperm.xlu0 %3546, %v3823_v33  }
 0x226   : > { %v2323_v16 = vpop.permute.xlu1 %2322  ;;  %v1339_v58 = vpop.permute.xlu0 %1338 }
 0x227   : > { %v1380_v49 = vsel %vm1358_vm5, %v1337_v28, %v1339_v58  ;;  %275 = vperm.xlu1 %3547, %v3824_v29  }
 0x228   : > { %1453 = vmatprep.subr.bf16.mxu1 %v1380_v49 }
 0x229   : > { %279 = vperm.xlu0 %3546, %v3825_v62  }
 0x22a   : > { %v1335_v18 = vpop.permute.xlu1 %1334  ;;  %v2325_v10 = vpop.permute.xlu0 %2324 }
 0x22b   : > { %v1379_v39 = vsel %vm1358_vm5, %v1335_v18, %v1337_v28  ;;  %v2354_v27 = vsel %vm2326_vm4, %v2323_v16, %v2325_v10  ;;  %283 = vperm.xlu1 %3547, %v3826_v36   ;;  %v3731_v28 = vld [vmem:[%s5301_s1 + $0x210] ss:$8 sps:$4 sm:$0xff]   ;;  %v3750_v36 = vld [vmem:[%s5301_s1 + $0x164] ss:$8 sps:$4 sm:$0xff]  }
 0x22c   : > { %1454 = vmatpush1.bf16.msra.mxu1 %v1379_v39  ;;  %2427 = vmatprep.subr.bf16.mxu0 %v2354_v27  ;;  %v3738_v39 = vld [vmem:[%s5301_s1 + $0x234] ss:$8 sps:$4 sm:$0xff]  }
 0x22d   : > { %287 = vperm.xlu0 %3546, %v3827_v20  }
 0x22e   : > { %v1343_v1 = vpop.permute.xlu1 %1342  ;;  %v2321_v21 = vpop.permute.xlu0 %2320 }
 0x22f   : > { %v2353_v15 = vsel %vm2326_vm4, %v2321_v21, %v2323_v16  ;;  %v3740_v21 = vld [vmem:[%s5301_s1 + $0x134] ss:$8 sps:$4 sm:$0xff]  }
 0x230   : > { %2428 = vmatpush1.bf16.msra.mxu0 %v2353_v15 }
 0x232   : > { %v2588_v8 = vpop.permute.xlu1 %2587  ;;  %v1345_v22 = vpop.permute.xlu0 %1344 }
 0x233   : > { %2434 = vmatmul.mubr.bf16.vlgmr.msra.gmra.mrb[0].mxu0 %v3708_v32  ;;  %v1382_v7 = vsel %vm1358_vm5, %v1343_v1, %v1345_v22  ;;  %v3743_v22 = vld [vmem:[%s5301_s1 + $0x230] ss:$8 sps:$4 sm:$0xff]  }
 0x234   : > { %1455 = vmatprep.subr.bf16.mxu1 %v1382_v7  ;;  %3316 = vmatprep.mubr.msk.bf16.mxu0 %vm790_vm2, %v3714_v63 }
 0x236   : > { %v1341_v23 = vpop.permute.xlu1 %1340  ;;  %v2590_v26 = vpop.permute.xlu0 %2589 }
 0x237   : > { %v1381_v42 = vsel %vm1358_vm5, %v1341_v23, %v1343_v1  ;;  %v2671_v11 = vsel %vm2669_vm6, %v2588_v8, %v2590_v26  ;;  %v3758_v23 = vld [vmem:[%s5301_s1 + $0x244] ss:$8 sps:$4 sm:$0xff]  }
 0x238   : > { %1456 = vmatpush1.bf16.msra.mxu1 %v1381_v42  ;;  %2744 = vmatprep.subr.bf16.mxu0 %v2671_v11 }
 0x23a   : > { %v1349_v13 = vpop.permute.xlu1 %1348  ;;  %v2586_v43 = vpop.permute.xlu0 %2585 }
 0x23b   : > { %v2670_v4 = vsel %vm2669_vm6, %v2586_v43, %v2588_v8  ;;  %2444 = vmatmul.mubr.bf16.gmra.mrb[4].mxu0 %v3719_v46  ;;  %v3742_v8 = vld [vmem:[%s5301_s1 + $0x130] ss:$8 sps:$4 sm:$0xff]  }
 0x23c   : > { %2745 = vmatpush1.bf16.msra.mxu0 %v2670_v4  ;;  %3317 = vmatprep.mubr.msk.bf16.mxu0 %vm790_vm2, %v3720_v37 }
 0x23e   : > { %v2594_v31 = vpop.permute.xlu1 %2593  ;;  %v1351_v14 = vpop.permute.xlu0 %1350 }
 0x23f   : > { %v1384_v38 = vsel %vm1358_vm5, %v1349_v13, %v1351_v14  ;;  %v3749_v14 = vld [vmem:[%s5301_s1 + $0x150] ss:$8 sps:$4 sm:$0xff]  }
 0x240   : > { %1457 = vmatprep.subr.bf16.mxu1 %v1384_v38 }
 0x242   : > { %v1347_v0 = vpop.permute.xlu1 %1346  ;;  %v2596_v52 = vpop.permute.xlu0 %2595 }
 0x243   : > { %v1383_v61 = vsel %vm1358_vm5, %v1347_v0, %v1349_v13  ;;  %2454 = vmatmul.mubr.bf16.gmra.mrb[8].mxu0 %v3725_v25  ;;  %v2673_v30 = vsel %vm2669_vm6, %v2594_v31, %v2596_v52  ;;  %v3747_v13 = vld [vmem:[%s5301_s1 + $0x154] ss:$8 sps:$4 sm:$0xff]  }
 0x244   : > { %1458 = vmatpush1.bf16.msra.mxu1 %v1383_v61  ;;  %2746 = vmatprep.subr.bf16.mxu0 %v2673_v30 }
 0x245   : > { %3318 = vmatprep.mubr.msk.bf16.mxu0 %vm790_vm2, %v3726_v17 }
 0x246   : > { %v1355_v40 = vpop.permute.xlu1 %1354  ;;  %v2592_v2 = vpop.permute.xlu0 %2591 }
 0x247   : > { %v2672_v35 = vsel %vm2669_vm6, %v2592_v2, %v2594_v31 }
 0x248   : > { %2747 = vmatpush1.bf16.msra.mxu0 %v2672_v35 }
 0x24a   : > { %v2600_v9 = vpop.permute.xlu1 %2599  ;;  %v1357_v16 = vpop.permute.xlu0 %1356 }
 0x24b   : > { %2464 = vmatmul.mubr.bf16.gmra.mrb[12].mxu0 %v3731_v28  ;;  %v1386_v58 = vsel %vm1358_vm5, %v1355_v40, %v1357_v16 }
 0x24c   : > { %1459 = vmatprep.subr.bf16.mxu1 %v1386_v58  ;;  %3319 = vmatprep.mubr.msk.bf16.mxu0 %vm790_vm2, %v3732_v34  ;;  %v3755_v58 = vld [vmem:[%s5301_s1 + $0x170] ss:$8 sps:$4 sm:$0xff]  }
 0x24e   : > { %v1353_v49 = vpop.permute.xlu1 %1352  ;;  %v2602_v55 = vpop.permute.xlu0 %2601 }
 0x24f   : > { %v1385_v18 = vsel %vm1358_vm5, %v1353_v49, %v1355_v40  ;;  %v2675_v10 = vsel %vm2669_vm6, %v2600_v9, %v2602_v55  ;;  %v3753_v40 = vld [vmem:[%s5301_s1 + $0x174] ss:$8 sps:$4 sm:$0xff]  }
 0x250   : > { %1460 = vmatpush1.bf16.msra.mxu1 %v1385_v18  ;;  %2748 = vmatprep.subr.bf16.mxu0 %v2675_v10  ;;  %v3761_v18 = vld [vmem:[%s5301_s1 + $0x274] ss:$8 sps:$4 sm:$0xff]  }
 0x251   : > { %3353 = vmatprep.subr.bf16.mxu1 %v2671_v11  ;;  %v3746_v11 = vld [vmem:[%s5301_s1 + $0x140] ss:$8 sps:$4 sm:$0xff]  }
 0x252   : > { %v2606_v27 = vpop.permute.xlu1 %2605  ;;  %v2598_v1 = vpop.permute.xlu0 %2597 }
 0x253   : > { %v2674_v12 = vsel %vm2669_vm6, %v2598_v1, %v2600_v9  ;;  %1466 = vmatmul.mubr.bf16.vlgmr.msra.gmra.mrb[0].mxu1 %v3734_v6  ;;  %2474 = vmatmul.mubr.bf16.gmra.mrb[16].mxu0 %v3737_v3 }
 0x254   : > { %3367 = vmatpush1.bf16.msra.mxu1 %v2670_v4  ;;  %2749 = vmatpush1.bf16.msra.mxu0 %v2674_v12 }
 0x255   : > { %3354 = vmatprep.subr.bf16.mxu1 %v2673_v30  ;;  %3320 = vmatprep.mubr.msk.bf16.mxu0 %vm790_vm2, %v3738_v39  ;;  %v3752_v30 = vld [vmem:[%s5301_s1 + $0x160] ss:$8 sps:$4 sm:$0xff]  }
 0x256   : > { %v2604_v41 = vpop.permute.xlu1 %2603  ;;  %v2608_v15 = vpop.permute.xlu0 %2607  ;;  %3238 = vmatprep.mubr.msk.bf16.mxu1 %vm790_vm2, %v3740_v21 }
 0x257   : > { %v2676_v32 = vsel %vm2669_vm6, %v2604_v41, %v2606_v27  ;;  %v2677_v63 = vsel %vm2669_vm6, %v2606_v27, %v2608_v15 }
 0x258   : > { %3368 = vmatpush1.bf16.msra.mxu1 %v2672_v35  ;;  %2750 = vmatprep.subr.bf16.mxu0 %v2677_v63 }
 0x259   : > { %3355 = vmatprep.subr.bf16.mxu1 %v2675_v10  ;;  %2751 = vmatpush1.bf16.msra.mxu0 %v2676_v32 }
 0x25a   : > { %v2614_v5 = vpop.permute.xlu1 %2613  ;;  %v2612_v7 = vpop.permute.xlu0 %2611 }
 0x25b   : > { %1476 = vmatmul.mubr.bf16.gmra.mrb[4].mxu1 %v3742_v8  ;;  %2484 = vmatmul.mubr.bf16.gmra.mrb[20].mxu0 %v3743_v22  ;;  %v2679_v26 = vsel %vm2669_vm6, %v2612_v7, %v2614_v5 }
 0x25c   : > { %3369 = vmatpush1.bf16.msra.mxu1 %v2674_v12  ;;  %2752 = vmatprep.subr.bf16.mxu0 %v2679_v26 }
 0x25d   : > { %3356 = vmatprep.subr.bf16.mxu1 %v2677_v63  ;;  %3239 = vmatprep.mubr.msk.bf16.mxu1 %vm790_vm2, %v3744_v19 }
 0x25e   : > { %v2618_v24 = vpop.permute.xlu1 %2617  ;;  %v2610_v33 = vpop.permute.xlu0 %2609  ;;  %3345 = vmatprep.mubr.msk.bf16.mxu0 %vm790_vm2, %v3758_v23 }
 0x25f   : > { %v2678_v42 = vsel %vm2669_vm6, %v2610_v33, %v2612_v7 }
 0x260   : > { %3370 = vmatpush1.bf16.msra.mxu1 %v2676_v32  ;;  %2753 = vmatpush1.bf16.msra.mxu0 %v2678_v42 }
 0x261   : > { %3357 = vmatprep.subr.bf16.mxu1 %v2679_v26 }
 0x262   : > { %v2616_v46 = vpop.permute.xlu1 %2615  ;;  %v2620_v37 = vpop.permute.xlu0 %2619 }
 0x263   : > { %v2680_v43 = vsel %vm2669_vm6, %v2616_v46, %v2618_v24  ;;  %1486 = vmatmul.mubr.bf16.gmra.mrb[8].mxu1 %v3746_v11  ;;  %v2681_v29 = vsel %vm2669_vm6, %v2618_v24, %v2620_v37  ;;  %v3756_v11 = vld [vmem:[%s5301_s1 + $0x240] ss:$8 sps:$4 sm:$0xff]   ;;  %v3759_v46 = vld [vmem:[%s5301_s1 + $0x270] ss:$8 sps:$4 sm:$0xff]   ;;  %v3762_v37 = vld [vmem:[%s5301_s1 + $0x254] ss:$8 sps:$4 sm:$0xff]  }
 0x264   : > { %3371 = vmatpush1.bf16.msra.mxu1 %v2678_v42  ;;  %2754 = vmatprep.subr.bf16.mxu0 %v2681_v29 }
 0x265   : > { %3358 = vmatprep.subr.bf16.mxu1 %v2681_v29  ;;  %2755 = vmatpush1.bf16.msra.mxu0 %v2680_v43  ;;  %v3767_v29 = vld [vmem:[%s5301_s1 + $0x280] ss:$8 sps:$4 sm:$0xff]  }
 0x266   : > { %v2626_v62 = vpop.permute.xlu1 %2625  ;;  %v2624_v4 = vpop.permute.xlu0 %2623  ;;  %3240 = vmatprep.mubr.msk.bf16.mxu1 %vm790_vm2, %v3747_v13  ;;  %v3764_v13 = vld [vmem:[%s5301_s1 + $0x284] ss:$8 sps:$4 sm:$0xff]  }
 0x267   : > { %v2683_v31 = vsel %vm2669_vm6, %v2624_v4, %v2626_v62  ;;  %v3768_v62 = vld [vmem:[%s5301_s1 + $0x264] ss:$8 sps:$4 sm:$0xff]  }
 0x268   : > { %3372 = vmatpush1.bf16.msra.mxu1 %v2680_v43  ;;  %2756 = vmatprep.subr.bf16.mxu0 %v2683_v31  ;;  %v3766_v43 = vld [vmem:[%s5301_s1 + $0x250] ss:$8 sps:$4 sm:$0xff]  }
 0x269   : > { %3359 = vmatprep.subr.bf16.mxu1 %v2683_v31  ;;  %v3844_v31 = vmov 2  }
 0x26a   : > { %v2630_v20 = vpop.permute.xlu1 %2629  ;;  %v2622_v38 = vpop.permute.xlu0 %2621  ;;  %3548 = vset.pattern.permute.xlu1 %v3844_v31  ;;  %3549 = vset.pattern.permute.xlu0 %v3844_v31 }
 0x26b   : > { %v2682_v25 = vsel %vm2669_vm6, %v2622_v38, %v2624_v4  ;;  %1496 = vmatmul.mubr.bf16.gmra.mrb[12].mxu1 %v3749_v14  ;;  %v3770_v4 = vld [vmem:[%s5301_s1 + $0x294] ss:$8 sps:$4 sm:$0xff]   ;;  %v290_v14 = vld [vmem:[%s5302_s2] sm:$0x1] }
 0x26c   : > { %2757 = vmatpush1.bf16.msra.mxu0 %v2682_v25  ;;  %3373 = vmatpush1.bf16.msra.mxu1 %v2682_v25 }
 0x26d   : > { %3241 = vmatprep.mubr.msk.bf16.mxu1 %vm790_vm2, %v3750_v36  ;;  %2993 = vperm.xlu1 %3548, %v290_v14   ;;  %v3772_v36 = vld [vmem:[%s5301_s1 + $0x260] ss:$8 sps:$4 sm:$0xff]  }
 0x26e   : > { %v2628_v17 = vpop.permute.xlu1 %2627  ;;  %v2632_v0 = vpop.permute.xlu0 %2631 }
 0x26f   : > { %v2684_v52 = vsel %vm2669_vm6, %v2628_v17, %v2630_v20  ;;  %v2685_v61 = vsel %vm2669_vm6, %v2630_v20, %v2632_v0  ;;  %v3773_v20 = vld [vmem:[%s5301_s1 + $0x290] ss:$8 sps:$4 sm:$0xff]  }
 0x270   : > { %2758 = vmatprep.subr.bf16.mxu0 %v2685_v61  ;;  %3360 = vmatprep.subr.bf16.mxu1 %v2685_v61 }
 0x271   : > { %2759 = vmatpush1.bf16.msra.mxu0 %v2684_v52  ;;  %3374 = vmatpush1.bf16.msra.mxu1 %v2684_v52 }
 0x272   : > { %v2638_v2 = vpop.permute.xlu1 %2637  ;;  %v2636_v35 = vpop.permute.xlu0 %2635 }
 0x273   : > { %1506 = vmatmul.mubr.bf16.gmra.mrb[16].mxu1 %v3752_v30  ;;  %v2687_v28 = vsel %vm2669_vm6, %v2636_v35, %v2638_v2 }
 0x274   : > { %2760 = vmatprep.subr.bf16.mxu0 %v2687_v28  ;;  %3361 = vmatprep.subr.bf16.mxu1 %v2687_v28 }
 0x275   : > { %3242 = vmatprep.mubr.msk.bf16.mxu1 %vm790_vm2, %v3753_v40 }
 0x276   : > { %v2642_v34 = vpop.permute.xlu1 %2641  ;;  %v2634_v9 = vpop.permute.xlu0 %2633 }
 0x277   : > { %v2686_v16 = vsel %vm2669_vm6, %v2634_v9, %v2636_v35 }
 0x278   : > { %2761 = vmatpush1.bf16.msra.mxu0 %v2686_v16  ;;  %3375 = vmatpush1.bf16.msra.mxu1 %v2686_v16 }
 0x27a   : > { %v2640_v49 = vpop.permute.xlu1 %2639  ;;  %v2644_v55 = vpop.permute.xlu0 %2643 }
 0x27b   : > { %v2688_v10 = vsel %vm2669_vm6, %v2640_v49, %v2642_v34  ;;  %1516 = vmatmul.mubr.bf16.gmra.mrb[20].mxu1 %v3755_v58  ;;  %v2689_v6 = vsel %vm2669_vm6, %v2642_v34, %v2644_v55 }
 0x27c   : > { %2762 = vmatprep.subr.bf16.mxu0 %v2689_v6  ;;  %3362 = vmatprep.subr.bf16.mxu1 %v2689_v6 }
 0x27d   : > { %2763 = vmatpush1.bf16.msra.mxu0 %v2688_v10  ;;  %3376 = vmatpush1.bf16.msra.mxu1 %v2688_v10 }
 0x27e   : > { %v2650_v3 = vpop.permute.xlu1 %2649  ;;  %v2648_v39 = vpop.permute.xlu0 %2647  ;;  %3348 = vmatprep.mubr.msk.bf16.mxu1 %vm790_vm2, %v3761_v18 }
 0x27f   : > { %v2691_v27 = vsel %vm2669_vm6, %v2648_v39, %v2650_v3 }
 0x280   : > { %2764 = vmatprep.subr.bf16.mxu0 %v2691_v27  ;;  %3363 = vmatprep.subr.bf16.mxu1 %v2691_v27 }
 0x282   : > { %v2654_v1 = vpop.permute.xlu1 %2653  ;;  %v2646_v21 = vpop.permute.xlu0 %2645 }
 0x283   : > { %v2690_v12 = vsel %vm2669_vm6, %v2646_v21, %v2648_v39 }
 0x284   : > { %2765 = vmatpush1.bf16.msra.mxu0 %v2690_v12  ;;  %3377 = vmatpush1.bf16.msra.mxu1 %v2690_v12 }
 0x286   : > { %v2652_v41 = vpop.permute.xlu1 %2651  ;;  %v2656_v15 = vpop.permute.xlu0 %2655 }
 0x287   : > { %v2692_v32 = vsel %vm2669_vm6, %v2652_v41, %v2654_v1  ;;  %v2693_v63 = vsel %vm2669_vm6, %v2654_v1, %v2656_v15 }
 0x288   : > { %2766 = vmatprep.subr.bf16.mxu0 %v2693_v63  ;;  %3364 = vmatprep.subr.bf16.mxu1 %v2693_v63 }
 0x289   : > { %2767 = vmatpush1.bf16.msra.mxu0 %v2692_v32  ;;  %3378 = vmatpush1.bf16.msra.mxu1 %v2692_v32 }
 0x28a   : > { %v2662_v8 = vpop.permute.xlu1 %2661  ;;  %v2660_v22 = vpop.permute.xlu0 %2659 }
 0x28b   : > { %v2695_v19 = vsel %vm2669_vm6, %v2660_v22, %v2662_v8 }
 0x28c   : > { %2768 = vmatprep.subr.bf16.mxu0 %v2695_v19  ;;  %3365 = vmatprep.subr.bf16.mxu1 %v2695_v19 }
 0x28e   : > { %v2666_v5 = vpop.permute.xlu1 %2665  ;;  %v2658_v7 = vpop.permute.xlu0 %2657 }
 0x28f   : > { %v2694_v23 = vsel %vm2669_vm6, %v2658_v7, %v2660_v22 }
 0x290   : > { %2769 = vmatpush1.bf16.msra.mxu0 %v2694_v23  ;;  %3379 = vmatpush1.bf16.msra.mxu1 %v2694_v23 }
 0x292   : > { %v2664_v26 = vpop.permute.xlu1 %2663  ;;  %v2668_v24 = vpop.permute.xlu0 %2667 }
 0x293   : > { %v2696_v33 = vsel %vm2669_vm6, %v2664_v26, %v2666_v5  ;;  %v2697_v42 = vsel %vm2669_vm6, %v2666_v5, %v2668_v24 }
 0x294   : > { %2770 = vmatprep.subr.bf16.mxu0 %v2697_v42  ;;  %3366 = vmatprep.subr.bf16.mxu1 %v2697_v42 }
 0x295   : > { %2771 = vmatpush1.bf16.msra.mxu0 %v2696_v33  ;;  %3380 = vmatpush1.bf16.msra.mxu1 %v2696_v33 }
 0x296   : > { %v248_v31 = vpop.permute.xlu1 %247 }
 0x298   : > { %2777 = vmatmul.mubr.bf16.vlgmr.msra.gmra.mrb[0].mxu0 %v3756_v11  ;;  %2807 = vmatmul.mubr.bf16.vlgmr.msra.gmra.mrb[24].mxu1 %v3759_v46  ;;  %v244_v14 = vpop.permute.xlu0 %243 }
 0x299   : > { %3346 = vmatprep.mubr.msk.bf16.mxu0 %vm790_vm2, %v3762_v37  ;;  %3349 = vmatprep.mubr.msk.bf16.mxu1 %vm790_vm2, %v3764_v13 }
 0x2a0   : > { %2787 = vmatmul.mubr.bf16.gmra.mrb[4].mxu0 %v3766_v43  ;;  %2817 = vmatmul.mubr.bf16.gmra.mrb[28].mxu1 %v3767_v29 }
 0x2a1   : > { %3347 = vmatprep.mubr.msk.bf16.mxu0 %vm790_vm2, %v3768_v62  ;;  %3350 = vmatprep.mubr.msk.bf16.mxu1 %vm790_vm2, %v3770_v4 }
 0x2a8   : > { %2797 = vmatmul.mubr.bf16.gmra.mrb[8].mxu0 %v3772_v36  ;;  %2827 = vmatmul.mubr.bf16.gmra.mrb[32].mxu1 %v3773_v20 }
 0x31e   : > { %v2465_v38 = vpop.f32.mrb[12].mxu0 }
 0x31f   : > { %v2467_v25 = vpop.f32.mrb[13].mxu0 }
 0x320   : > { %v2469_v17 = vpop.f32.mrb[14].mxu0 }
 0x321   : > { %v2471_v0 = vpop.f32.mrb[15].mxu0 }
 0x326   : > { %v1467_v52 = vpop.f32.mrb[0].mxu1  ;;  %v2475_v61 = vpop.f32.mrb[16].mxu0 }
 0x327   : > { %v1469_v30 = vpop.f32.mrb[1].mxu1  ;;  %v2477_v40 = vpop.f32.mrb[17].mxu0 }
 0x328   : > { %v1471_v2 = vpop.f32.mrb[2].mxu1  ;;  %v2479_v35 = vpop.f32.mrb[18].mxu0 }
 0x329   : > { %v1473_v28 = vpop.f32.mrb[3].mxu1  ;;  %v2481_v34 = vpop.f32.mrb[19].mxu0 }
 0x32e   : > { %v5215_v9 = vpop.f32.mrb[4].mxu1  ;;  %v2485_v16 = vpop.f32.mrb[20].mxu0 }
 0x32f   : > { %v5217_v58 = vpop.f32.mrb[5].mxu1  ;;  %v2487_v49 = vpop.f32.mrb[21].mxu0 }
 0x330   : > { %v5219_v55 = vpop.f32.mrb[6].mxu1  ;;  %v2489_v18 = vpop.f32.mrb[22].mxu0 }
 0x331   : > { %v5221_v10 = vpop.f32.mrb[7].mxu1  ;;  %v2491_v6 = vpop.f32.mrb[23].mxu0 }
 0x336   : > { %v5223_v3 = vpop.f32.mrb[8].mxu1 }
 0x337   : > { %v5225_v39 = vpop.f32.mrb[9].mxu1 }
 0x338   : > { %v5227_v27 = vpop.f32.mrb[10].mxu1 }
 0x339   : > { %v5229_v1 = vpop.f32.mrb[11].mxu1 }
 0x33e   : > { %v1497_v21 = vpop.f32.mrb[12].mxu1 }
 0x33f   : > { %v3393_v12 = vadd.f32 %v2465_v38, %v1497_v21  ;;  %v1499_v41 = vpop.f32.mrb[13].mxu1 }
 0x340   : > { %v3395_v15 = vadd.f32 %v2467_v25, %v1499_v41  ;;  %v1501_v32 = vpop.f32.mrb[14].mxu1 }
 0x341   : > { %v3397_v63 = vadd.f32 %v2469_v17, %v1501_v32  ;;  %v1503_v8 = vpop.f32.mrb[15].mxu1 }
 0x342   : > { %v3399_v22 = vadd.f32 %v2471_v0, %v1503_v8 }
 0x346   : > { %v1507_v19 = vpop.f32.mrb[16].mxu1 }
 0x347   : > { %v3401_v5 = vadd.f32 %v2475_v61, %v1507_v19  ;;  %v1509_v7 = vpop.f32.mrb[17].mxu1  ;;  %v252_v19 = vpop.permute.xlu1 %251 }
 0x348   : > { %v3403_v23 = vadd.f32 %v2477_v40, %v1509_v7  ;;  %v1511_v26 = vpop.f32.mrb[18].mxu1  ;;  %v256_v7 = vpop.permute.xlu0 %255 }
 0x349   : > { %v3405_v24 = vadd.f32 %v2479_v35, %v1511_v26  ;;  %v1513_v33 = vpop.f32.mrb[19].mxu1 }
 0x34a   : > { %v5231_v42 = vadd.f32 %v2481_v34, %v1513_v33 }
 0x34e   : > { %v1517_v11 = vpop.f32.mrb[20].mxu1 }
 0x34f   : > { %v5233_v46 = vadd.f32 %v2485_v16, %v1517_v11  ;;  %v1519_v37 = vpop.f32.mrb[21].mxu1 }
 0x350   : > { %v5235_v13 = vadd.f32 %v2487_v49, %v1519_v37  ;;  %v1521_v43 = vpop.f32.mrb[22].mxu1 }
 0x351   : > { %v5237_v29 = vadd.f32 %v2489_v18, %v1521_v43  ;;  %v1523_v62 = vpop.f32.mrb[23].mxu1 }
 0x352   : > { %v5239_v4 = vadd.f32 %v2491_v6, %v1523_v62 }
 0x36b   : > { %v2778_v36 = vpop.f32.mrb[0].mxu0  ;;  %v2808_v20 = vpop.f32.mrb[24].mxu1 }
 0x36c   : > { %v3381_v38 = vadd.f32 %v2778_v36, %v1467_v52  ;;  %v5241_v25 = vadd.f32 %v3393_v12, %v2808_v20  ;;  %v2780_v17 = vpop.f32.mrb[1].mxu0  ;;  %v2810_v0 = vpop.f32.mrb[25].mxu1 }
 0x36d   : > { %v3382_v61 = vadd.f32 %v2780_v17, %v1469_v30  ;;  %v5243_v40 = vadd.f32 %v3395_v15, %v2810_v0  ;;  %v2782_v35 = vpop.f32.mrb[2].mxu0  ;;  %v2812_v34 = vpop.f32.mrb[26].mxu1 }
 0x36e   : > { %v2885_v16 = vadd.f32 %v3381_v38, %v4117_v45  ;;  %v3383_v49 = vadd.f32 %v2782_v35, %v1471_v2  ;;  %v5246_v18 = vadd.f32 %v3397_v63, %v2812_v34  ;;  %v2784_v6 = vpop.f32.mrb[3].mxu0  ;;  %v2814_v21 = vpop.f32.mrb[27].mxu1 }
 0x36f   : > { %v2886_v41 = vadd.f32 %v3382_v61, %v4117_v45  ;;  %v3384_v32 = vadd.f32 %v2784_v6, %v1473_v28  ;;  %v5249_v52 = vadd.f32 %v3399_v22, %v2814_v21  ;;  %v260_v21 = vpop.permute.xlu1 %259 }
 0x370   : > { %v2909_v12 = vmax.f32 %v2885_v16, 0.0  ;;  %v2887_v8 = vadd.f32 %v3383_v49, %v4128_v48 }
 0x371   : > { %v2910_v30 = vmax.f32 %v2886_v41, 0.0  ;;  %v2888_v15 = vadd.f32 %v3384_v32, %v4128_v48  ;;  %v264_v41 = vpop.permute.xlu0 %263 }
 0x372   : > { %v2911_v26 = vmax.f32 %v2887_v8, 0.0  ;;  %v2933_v11 = vmul.f32 %v2909_v12, %v244_v14 }
 0x373   : > { %v2912_v33 = vmax.f32 %v2888_v15, 0.0  ;;  %v2788_v2 = vpop.f32.mrb[4].mxu0  ;;  %v2818_v63 = vpop.f32.mrb[28].mxu1  ;;  %v2934_v62 = vmul.f32 %v2910_v30, %v244_v14 }
 0x374   : > { %v2935_v37 = vmul.f32 %v2911_v26, %v248_v31  ;;  %v3385_v43 = vadd.f32 %v2788_v2, %v5215_v9  ;;  %v3402_v45 = vadd.f32 %v3401_v5, %v2818_v63  ;;  %v2790_v28 = vpop.f32.mrb[5].mxu0  ;;  %v2820_v22 = vpop.f32.mrb[29].mxu1 }
 0x375   : > { %v2936_v36 = vmul.f32 %v2912_v33, %v248_v31  ;;  %v3386_v20 = vadd.f32 %v2790_v28, %v5217_v58  ;;  %v5255_v38 = vadd.f32 %v3403_v23, %v2820_v22  ;;  %v2792_v48 = vpop.f32.mrb[6].mxu0  ;;  %v2822_v17 = vpop.f32.mrb[30].mxu1 }
 0x376   : > { %v2957_v0 = vadd.f32 %v2935_v37, %v2933_v11  ;;  %v2889_v61 = vadd.f32 %v3385_v43, %v4115_v44  ;;  %v3387_v35 = vadd.f32 %v2792_v48, %v5219_v55  ;;  %v2794_v34 = vpop.f32.mrb[7].mxu0  ;;  %v2824_v16 = vpop.f32.mrb[31].mxu1  ;;  %v3406_v5 = vadd.f32 %v3405_v24, %v2822_v17 }
 0x377   : > { %v2974_v49 = vadd.f32 %v2936_v36, %v2934_v62  ;;  %v2890_v9 = vadd.f32 %v3386_v20, %v4115_v44  ;;  %v3388_v58 = vadd.f32 %v2794_v34, %v5221_v10  ;;  %v3408_v14 = vadd.f32 %v5231_v42, %v2824_v16 }
 0x378   : > { %v2913_v6 = vmax.f32 %v2889_v61, 0.0  ;;  %v2891_v31 = vadd.f32 %v3387_v35, %v4126_v47  ;;  %v2897_v10 = vadd.f32 %v5241_v25, %v4150_v54  ;;  %v2899_v20 = vadd.f32 %v5246_v18, %v4148_v53 }
 0x379   : > { %v2914_v23 = vmax.f32 %v2890_v9, 0.0  ;;  %v2892_v55 = vadd.f32 %v3388_v58, %v4126_v47  ;;  %v2901_v18 = vadd.f32 %v3402_v45, %v4161_v57  ;;  %v272_v9 = vpop.permute.xlu0 %271 }
 0x37a   : > { %v2937_v32 = vmul.f32 %v2913_v6, %v252_v19  ;;  %v2915_v12 = vmax.f32 %v2891_v31, 0.0  ;;  %v2921_v61 = vmax.f32 %v2897_v10, 0.0 }
 0x37b   : > { %v2938_v8 = vmul.f32 %v2914_v23, %v252_v19  ;;  %v2798_v30 = vpop.f32.mrb[8].mxu0  ;;  %v2828_v15 = vpop.f32.mrb[32].mxu1  ;;  %v2916_v24 = vmax.f32 %v2892_v55, 0.0  ;;  %v2925_v23 = vmax.f32 %v2901_v18, 0.0 }
 0x37c   : > { %v2958_v26 = vadd.f32 %v2957_v0, %v2937_v32  ;;  %v2939_v44 = vmul.f32 %v2915_v12, %v256_v7  ;;  %v3389_v33 = vadd.f32 %v2798_v30, %v5223_v3  ;;  %v2800_v2 = vpop.f32.mrb[9].mxu0  ;;  %v2830_v63 = vpop.f32.mrb[33].mxu1  ;;  %v3410_v11 = vadd.f32 %v5233_v46, %v2828_v15 }
 0x37d   : > { %v2975_v42 = vadd.f32 %v2974_v49, %v2938_v8  ;;  %v2802_v37 = vpop.f32.mrb[10].mxu0  ;;  %v2832_v43 = vpop.f32.mrb[34].mxu1  ;;  %v2940_v47 = vmul.f32 %v2916_v24, %v256_v7  ;;  %v3390_v22 = vadd.f32 %v2800_v2, %v5225_v39  ;;  %v2898_v3 = vadd.f32 %v5243_v40, %v4150_v54 }
 0x37e   : > { %v2959_v28 = vadd.f32 %v2958_v26, %v2939_v44  ;;  %v2893_v19 = vadd.f32 %v3389_v33, %v4139_v51  ;;  %v2804_v62 = vpop.f32.mrb[11].mxu0  ;;  %v2834_v36 = vpop.f32.mrb[35].mxu1  ;;  %v3412_v25 = vadd.f32 %v5235_v13, %v2830_v63  ;;  %v3391_v46 = vadd.f32 %v2802_v37, %v5227_v27 }
 0x37f   : > { %v2976_v48 = vadd.f32 %v2975_v42, %v2940_v47  ;;  %v2894_v7 = vadd.f32 %v3390_v22, %v4139_v51  ;;  %v3414_v0 = vadd.f32 %v5237_v29, %v2832_v43  ;;  %v2900_v39 = vadd.f32 %v5249_v52, %v4148_v53  ;;  %v268_v40 = vpop.permute.xlu1 %267 }
 0x380   : > { %v2917_v17 = vmax.f32 %v2893_v19, 0.0  ;;  %v2895_v35 = vadd.f32 %v3391_v46, %v4137_v50  ;;  %v3392_v54 = vadd.f32 %v2804_v62, %v5229_v1  ;;  %v3416_v27 = vadd.f32 %v5239_v4, %v2834_v36 }
 0x381   : > { %v2918_v34 = vmax.f32 %v2894_v7, 0.0  ;;  %v2922_v16 = vmax.f32 %v2898_v3, 0.0  ;;  %v2923_v49 = vmax.f32 %v2899_v20, 0.0  ;;  %v2902_v53 = vadd.f32 %v5255_v38, %v4161_v57 }
 0x382   : > { %v2941_v13 = vmul.f32 %v2917_v17, %v260_v21  ;;  %v2919_v51 = vmax.f32 %v2895_v35, 0.0  ;;  %v2896_v29 = vadd.f32 %v3392_v54, %v4137_v50  ;;  %v2903_v52 = vadd.f32 %v3406_v5, %v4159_v56 }
 0x383   : > { %v2942_v1 = vmul.f32 %v2918_v34, %v260_v21  ;;  %v2924_v45 = vmax.f32 %v2900_v39, 0.0  ;;  %v2904_v32 = vadd.f32 %v3408_v14, %v4159_v56  ;;  %v2945_v12 = vmul.f32 %v2921_v61, %v268_v40  ;;  %v276_v38 = vpop.permute.xlu1 %275  ;;  %v280_v14 = vpop.permute.xlu0 %279 }
 0x384   : > { %v2960_v6 = vadd.f32 %v2959_v28, %v2941_v13  ;;  %v2943_v31 = vmul.f32 %v2919_v51, %v264_v41  ;;  %v2920_v58 = vmax.f32 %v2896_v29, 0.0  ;;  %v2905_v55 = vadd.f32 %v3410_v11, %v4172_v60 }
 0x385   : > { %v2977_v4 = vadd.f32 %v2976_v48, %v2942_v1  ;;  %v2946_v30 = vmul.f32 %v2922_v16, %v268_v40  ;;  %v2947_v15 = vmul.f32 %v2923_v49, %v272_v9  ;;  %v2926_v26 = vmax.f32 %v2902_v53, 0.0 }
 0x386   : > { %v2961_v8 = vadd.f32 %v2960_v6, %v2943_v31  ;;  %v2944_v50 = vmul.f32 %v2920_v58, %v264_v41  ;;  %v2927_v57 = vmax.f32 %v2903_v52, 0.0  ;;  %v2906_v5 = vadd.f32 %v3412_v25, %v4172_v60 }
 0x387   : > { %v2907_v44 = vadd.f32 %v3414_v0, %v4170_v59  ;;  %v2948_v33 = vmul.f32 %v2924_v45, %v272_v9  ;;  %v2949_v2 = vmul.f32 %v2925_v23, %v276_v38  ;;  %v2928_v56 = vmax.f32 %v2904_v32, 0.0  ;;  %v284_v22 = vpop.permute.xlu1 %283  ;;  %v288_v25 = vpop.permute.xlu0 %287 }
 0x388   : > { %v2962_v21 = vadd.f32 %v2961_v8, %v2945_v12  ;;  %v2978_v24 = vadd.f32 %v2977_v4, %v2944_v50  ;;  %v2929_v63 = vmax.f32 %v2905_v55, 0.0  ;;  %v2908_v41 = vadd.f32 %v3416_v27, %v4170_v59 }
 0x389   : > { %v2950_v11 = vmul.f32 %v2926_v26, %v276_v38  ;;  %v2951_v37 = vmul.f32 %v2927_v57, %v280_v14  ;;  %v2930_v43 = vmax.f32 %v2906_v5, 0.0  ;;  %v2931_v28 = vmax.f32 %v2907_v44, 0.0 }
 0x38a   : > { %v2963_v10 = vadd.f32 %v2962_v21, %v2947_v15  ;;  %v2979_v42 = vadd.f32 %v2978_v24, %v2946_v30  ;;  %v2952_v60 = vmul.f32 %v2928_v56, %v280_v14  ;;  %v2953_v62 = vmul.f32 %v2929_v63, %v284_v22 }
 0x38b   : > { %v2932_v3 = vmax.f32 %v2908_v41, 0.0  ;;  %v2954_v46 = vmul.f32 %v2930_v43, %v284_v22  ;;  %v2955_v48 = vmul.f32 %v2931_v28, %v288_v25  ;;  %v3845_v16 = vmov 1966171168   ;;  %v2994_v53 = vpop.permute.xlu1 %2993 }
 0x38c   : > { %v2964_v47 = vadd.f32 %v2963_v10, %v2949_v2  ;;  %v2980_v19 = vadd.f32 %v2979_v42, %v2948_v33  ;;  %v3004_v49 = vunpack.c.l.s4 %v3845_v16  ;;  %v3006_v51 = vlaneseq }
 0x38d   : > { %v2956_v61 = vmul.f32 %v2932_v3, %v288_v25 }
 0x38e   : > { %v2965_v36 = vadd.f32 %v2964_v47, %v2951_v37  ;;  %v2981_v20 = vadd.f32 %v2980_v19, %v2950_v11  ;;  %v3005_v1 = vunpack.c.0.s8 %v3004_v49  ;;  %v3007_v31 = vshrl.u32 %v3006_v51, 7 }
 0x38f   : > { %vm3020_vm7 = vcmp.lt.s32.totalorder %v3006_v51, 256 }
 0x390   : > { %v2966_v17 = vadd.f32 %v2965_v36, %v2953_v62  ;;  %v2982_v7 = vadd.f32 %v2981_v20, %v2952_v60  ;;  %v3008_v4 = vsub.s32 %v3005_v1, %v3007_v31 }
 0x392   : > { %v2967_v0 = vadd.f32 %v2966_v17, %v2955_v48  ;;  %v2983_v59 = vadd.f32 %v2982_v7, %v2954_v46 }
 0x394   : > { %v2984_v39 = vadd.f32 %v2983_v59, %v2956_v61  ;;  %v2968_v35 = vrot.slane %v2967_v0, 4 }
 0x396   : > { %v2969_v54 = vadd.f32 %v2968_v35, %v2967_v0  ;;  %v2985_v40 = vrot.slane %v2984_v39, 4 }
 0x398   : > { %v2970_v18 = vrot.slane %v2969_v54, 2  ;;  %v2986_v13 = vadd.f32 %v2985_v40, %v2984_v39 }
 0x39a   : > { %v2971_v34 = vadd.f32 %v2970_v18, %v2969_v54  ;;  %v2987_v27 = vrot.slane %v2986_v13, 2 }
 0x39c   : > { %v2972_v29 = vrot.slane %v2971_v34, 1  ;;  %v2988_v9 = vadd.f32 %v2987_v27, %v2986_v13 }
 0x39e   : > { %v2973_v52 = vadd.f32 %v2972_v29, %v2971_v34  ;;  %v2989_v6 = vrot.slane %v2988_v9, 1 }
 0x3a0   : > { %v2990_v58 = vadd.f32 %v2989_v6, %v2988_v9  ;;  %v2996_v45 = vadd.f32 %v2994_v53, %v2973_v52 }
 0x3a2   : > { %v2997_v23 = vadd.f32 %v2994_v53, %v2990_v58  ;;  %v2998_v32 = vmax.f32 %v2996_v45, 0.0 }
 0x3a4   : > { %v2999_v12 = vmax.f32 %v2997_v23, 0.0 }
 0x3a6   : > { %v3002_v55 = vcombine.low %v2998_v32, %v2999_v12 }
 0x3a8   : > { %v3009_v8 = vrot.slane %v3002_v55, %v3008_v4 }
 0x3aa   : > { %v3016_v50 = vrot.slane %v3009_v8, %v3008_v4 }
 0x3ac   : > { %3022 = vst.msk [vmem:[%s168_s4] sm:$0x3] %vm3020_vm7, %v3016_v50 }
 0x3ad PF: > { %s13_s12 = sadd.s32 1, %s3834_s12  }
 0x3ae   : > { %p10_p4 = scmp.ge.s32.totalorder %s13_s12, 4  }
 0x3b0   :  { %12 = sbr.rel (!%p10_p4) target bundleno = 1 (0x1), region = 68 }

</bundles_post_ra>
